<compile_context>
chip_gen: v6e
topology: v6e:2x2x1
jax: 0.10.0
libtpu: 0.0.40
codegen_flags: <defaults>
</compile_context>

<pallas_src>
import functools

import jax
import jax.numpy as jnp
from jax import lax
from jax.experimental import pallas as pl
from jax.experimental.pallas import tpu as pltpu

_BN_EPS = 1e-5
_LANES = 128


def _conv_band(xp_ref, w_ref, r, *, th, w_out, cin, cout_p):
    """3x3 conv (no bias) for one row band -> (TH*W, Cout_p) f32 accumulator.

    xp_ref: (H+2, W+2, Cin) bf16 padded image (VMEM resident per image).
    w_ref : (9, Cin, Cout_p) bf16 weights, tap index j = kh*3 + kw.
    """
    h0 = r * th
    if th % 8 == 0:
        h0 = pl.multiple_of(h0, 8)
    acc = jnp.zeros((th * w_out, cout_p), jnp.float32)
    for kh in range(3):
        # One aligned load of the full (TH, W+2, Cin) slab per kh; the kw taps are
        # static sublane-shifted slices of this value (no extra VMEM traffic).
        slab = xp_ref[pl.ds(h0 + kh, th), :, :]
        for kw in range(3):
            # Layout no-op reshape when W is a multiple of the bf16 sublane tile (16).
            tap = slab[:, kw:kw + w_out, :].reshape(th * w_out, cin)
            acc = acc + jnp.dot(tap, w_ref[kh * 3 + kw],
                                preferred_element_type=jnp.float32)
    return acc


def _stats_kernel(xp_ref, w_ref, stat_ref, *, th, w_out, cin, cout_p):
    # stat_ref: (2, Cout_p) f32 -> [sum, sum of squares] for this (n, r) band.
    acc = _conv_band(xp_ref, w_ref, pl.program_id(1),
                     th=th, w_out=w_out, cin=cin, cout_p=cout_p)
    stat_ref[pl.ds(0, 1), :] = jnp.sum(acc, axis=0, keepdims=True)
    stat_ref[pl.ds(1, 1), :] = jnp.sum(acc * acc, axis=0, keepdims=True)


def _apply_kernel(xp_ref, w_ref, scale_ref, shift_ref, o_ref,
                  *, th, w_out, cin, cout_p):
    acc = _conv_band(xp_ref, w_ref, pl.program_id(1),
                     th=th, w_out=w_out, cin=cin, cout_p=cout_p)
    y = acc * scale_ref[...] + shift_ref[...]
    o_ref[...] = jnp.maximum(y, 0.0).astype(o_ref.dtype)


def _vmem_budget_bytes():
    cap = None
    try:
        cap = getattr(pltpu.get_tpu_info(), "vmem_capacity_bytes", None)
    except Exception:
        cap = None
    if not cap:
        cap = 64 * 1024 * 1024          # conservative fallback: v7x per-core VMEM
    return int(0.75 * int(cap))


def _pick_row_tile(h, w, cin, cout_p, budget):
    """Largest multiple-of-8 divisor of H whose per-step footprint fits the budget."""
    if h % 8 != 0 or h <= 8:
        return h
    fixed = 2 * (h + 2) * (w + 2) * cin * 2 + 2 * 9 * cin * cout_p * 2
    per_row = w * (cout_p * 4 * 4 + cin * 2 * 6)   # f32 acc + out dbl-buf + bf16 slabs
    max_rows_mem = max((budget - fixed) // max(per_row, 1), 8)
    max_rows_acc = max((4 * 1024 * 1024) // max(4 * cout_p * w, 1), 8)  # cap live f32 acc
    max_rows = min(max_rows_mem, max_rows_acc)
    best, th = 8, 8
    while th <= h:
        if h % th == 0 and th <= max_rows:
            best = th
        th += 8
    return best


def conv_block_forward(x_nchw, w_oihw, bias, gamma, beta, *, row_tile=None):
    """conv_block forward: Conv2d(3x3,s1,p1,bias) + train-mode BatchNorm2d + ReLU.

    x_nchw: (N, Cin, H, W) -> (N, Cout, H, W), matching the PyTorch module.
    `bias` is accepted for API parity but unused: under train-mode BatchNorm the
    conv bias cancels exactly (it shifts the activation and its batch mean equally).
    """
    del bias
    N, Cin, H, W = x_nchw.shape
    Cout = w_oihw.shape[0]
    Cp = ((Cout + _LANES - 1) // _LANES) * _LANES      # lane-dense output channels

    budget = _vmem_budget_bytes()
    if row_tile is None:
        row_tile = _pick_row_tile(H, W, Cin, Cp, budget)
    TH = row_tile
    assert H % TH == 0, "row_tile must divide H"
    R = H // TH

    # --- layout glue only (no compute duplication) ---
    # TODO(synk): keep activations NHWC/bf16 across UNet blocks so these transposes
    # and the jnp.pad (extra HBM round trips done by XLA) fold away.
    x_nhwc = jnp.transpose(x_nchw, (0, 2, 3, 1))
    xp = jnp.pad(x_nhwc, ((0, 0), (1, 1), (1, 1), (0, 0))).astype(jnp.bfloat16)

    # (Cout, Cin, 3, 3) -> (9, Cin, Cp); tap j = kh*3 + kw, zero-padded Cout -> Cp.
    w2 = jnp.transpose(w_oihw, (2, 3, 1, 0)).reshape(9, Cin, Cout)
    w2 = jnp.pad(w2, ((0, 0), (0, 0), (0, Cp - Cout))).astype(jnp.bfloat16)
    g2 = jnp.pad(gamma.astype(jnp.float32), (0, Cp - Cout))    # 0 on padded channels
    be2 = jnp.pad(beta.astype(jnp.float32), (0, Cp - Cout))

    img_spec = pl.BlockSpec((None, H + 2, W + 2, Cin), lambda n, r: (n, 0, 0, 0))
    w_spec = pl.BlockSpec((9, Cin, Cp), lambda n, r: (0, 0, 0))
    vec_spec = pl.BlockSpec((1, Cp), lambda n, r: (0, 0))

    cparams = pltpu.CompilerParams(
        dimension_semantics=("parallel", "parallel"),
        vmem_limit_bytes=int(budget))

    common = dict(th=TH, w_out=W, cin=Cin, cout_p=Cp)

    # ---- pass 1: per-band partial BN statistics (fully parallel grid) ----
    stats = pl.pallas_call(
        functools.partial(_stats_kernel, **common),
        out_shape=jax.ShapeDtypeStruct((N, R, 2, Cp), jnp.float32),
        grid_spec=pltpu.PrefetchScalarGridSpec(
            num_scalar_prefetch=0, grid=(N, R),
            in_specs=[img_spec, w_spec],
            out_specs=pl.BlockSpec((None, None, 2, Cp), lambda n, r: (n, r, 0, 0))),
        compiler_params=cparams,
    )(xp, w2)

    # ---- tiny XLA reduction + BN scale/shift folding ----
    # TODO(synk): mean-shifted / compensated partials if N*H*W gets large enough for
    # f32 sum / sum-of-squares cancellation to matter.
    tot = jnp.sum(stats, axis=(0, 1))                    # (2, Cp)
    inv_m = 1.0 / float(N * H * W)
    mean = tot[0] * inv_m
    var = jnp.maximum(tot[1] * inv_m - mean * mean, 0.0)
    scale = g2 * lax.rsqrt(var + _BN_EPS)                # 0 on padded channels
    shift = be2 - mean * scale
    scale2 = scale.reshape(1, Cp)
    shift2 = shift.reshape(1, Cp)

    # ---- pass 2: recompute conv, apply folded BN affine + ReLU (fully parallel) ----
    # TODO(synk): on v5e, stash the bf16 conv activation from pass 1 instead of
    # recomputing here once Cin >~ 64 (bandwidth-vs-recompute tradeoff flips).
    out_flat = pl.pallas_call(
        functools.partial(_apply_kernel, **common),
        out_shape=jax.ShapeDtypeStruct((N, H * W, Cp), x_nchw.dtype),
        grid_spec=pltpu.PrefetchScalarGridSpec(
            num_scalar_prefetch=0, grid=(N, R),
            in_specs=[img_spec, w_spec, vec_spec, vec_spec],
            out_specs=pl.BlockSpec((None, TH * W, Cp), lambda n, r: (n, r, 0))),
        compiler_params=cparams,
    )(xp, w2, scale2, shift2)

    out_nhwc = out_flat[:, :, :Cout].reshape(N, H, W, Cout)
    return jnp.transpose(out_nhwc, (0, 3, 1, 2))  # back to NCHW (PyTorch parity)


if __name__ == "__main__":
    key = jax.random.PRNGKey(0)
    k1, k2, k3, k4, k5 = jax.random.split(key, 5)

    # Small shapes consistent with the module's conv_block usage.
    N, Cin, Cout, H, W = 2, 4, 8, 16, 16

    x = jax.random.normal(k1, (N, Cin, H, W), jnp.float32)
    w_conv = jax.random.normal(k2, (Cout, Cin, 3, 3), jnp.float32) / jnp.sqrt(Cin * 9.0)
    b_conv = 0.1 * jax.random.normal(k3, (Cout,), jnp.float32)
    gamma = 1.0 + 0.1 * jax.random.normal(k4, (Cout,), jnp.float32)  # BN weight
    beta = 0.1 * jax.random.normal(k5, (Cout,), jnp.float32)         # BN bias

    out = conv_block_forward(x, w_conv, b_conv, gamma, beta, row_tile=8)
    out = jax.block_until_ready(out)

    # Pure-JAX f32 reference with the module's exact forward semantics.
    conv = lax.conv_general_dilated(
        x, w_conv, window_strides=(1, 1), padding=((1, 1), (1, 1)),
        dimension_numbers=("NCHW", "OIHW", "NCHW"))
    conv = conv + b_conv[None, :, None, None]
    mean = jnp.mean(conv, axis=(0, 2, 3), keepdims=True)
    var = jnp.mean((conv - mean) ** 2, axis=(0, 2, 3), keepdims=True)
    ref = (conv - mean) / jnp.sqrt(var + _BN_EPS)
    ref = ref * gamma[None, :, None, None] + beta[None, :, None, None]
    ref = jnp.maximum(ref, 0.0)

    assert out.shape == (N, Cout, H, W)
    # bf16 matmul operands (f32 accumulation) -> tolerance consistent with bf16.
    assert jnp.allclose(out, ref, atol=3e-2, rtol=3e-2), float(jnp.max(jnp.abs(out - ref)))
    print("KERNEL_OK")
</pallas_src>

<mosaic_0001>
module attributes {stable_mosaic.version = 11 : i64} {
  func.func @_stats_kernel(%arg0: i32, %arg1: i32, %arg2: memref<1x18x18x4xbf16, #tpu.memory_space<vmem>>, %arg3: memref<9x4x128xbf16, #tpu.memory_space<vmem>>, %arg4: memref<1x1x2x128xf32, #tpu.memory_space<vmem>>) attributes {dimension_semantics = [#tpu.dimension_semantics<parallel>, #tpu.dimension_semantics<parallel>], iteration_bounds = array<i64: 2, 2>, scalar_prefetch = 0 : i64, scratch_operands = 0 : i64, tpu.core_type = #tpu.core_type<tc>, window_params = [{transform_indices = @transform_0, window_bounds = array<i64: 1, 18, 18, 4>}, {pipeline_mode = #tpu.pipeline_mode<synchronous>, transform_indices = @transform_1, window_bounds = array<i64: 9, 4, 128>}, {transform_indices = @transform_2, window_bounds = array<i64: 1, 1, 2, 128>}]} {
    %c8_i32 = arith.constant 8 : i32
    %0 = arith.muli %arg1, %c8_i32 : i32
    %1 = tpu.assume_multiple %0, 8 : i32
    %cst = arith.constant 0.000000e+00 : f32
    %2 = vector.broadcast %cst : f32 to vector<128x128xf32>
    %c0_i32 = arith.constant 0 : i32
    %3 = arith.addi %1, %c0_i32 : i32
    %c0 = arith.constant 0 : index
    %4 = arith.index_cast %3 : i32 to index
    %c0_0 = arith.constant 0 : index
    %c0_1 = arith.constant 0 : index
    %5 = vector.load %arg2[%c0, %4, %c0_0, %c0_1] : memref<1x18x18x4xbf16, #tpu.memory_space<vmem>>, vector<1x8x18x4xbf16>
    %6 = vector.shape_cast %5 : vector<1x8x18x4xbf16> to vector<8x18x4xbf16>
    %7 = vector.extract_strided_slice %6 {offsets = [0, 0, 0], sizes = [8, 16, 4], strides = [1, 1, 1]} : vector<8x18x4xbf16> to vector<8x16x4xbf16>
    %8 = vector.shape_cast %7 : vector<8x16x4xbf16> to vector<128x4xbf16>
    %c0_2 = arith.constant 0 : index
    %c0_3 = arith.constant 0 : index
    %c0_4 = arith.constant 0 : index
    %9 = vector.load %arg3[%c0_2, %c0_3, %c0_4] : memref<9x4x128xbf16, #tpu.memory_space<vmem>>, vector<1x4x128xbf16>
    %10 = vector.shape_cast %9 : vector<1x4x128xbf16> to vector<4x128xbf16>
    %cst_5 = arith.constant dense<0.000000e+00> : vector<128x128xf32>
    %11 = tpu.matmul %8, %10, %cst_5 {dimension_numbers = #tpu.dot_dimension_numbers<[1], [0], [0], [1], [0, 0, 1, 1], [], []>} : vector<128x4xbf16>, vector<4x128xbf16>, vector<128x128xf32> -> vector<128x128xf32>
    %12 = arith.addf %2, %11 : vector<128x128xf32>
    %13 = vector.extract_strided_slice %6 {offsets = [0, 1, 0], sizes = [8, 16, 4], strides = [1, 1, 1]} : vector<8x18x4xbf16> to vector<8x16x4xbf16>
    %14 = vector.shape_cast %13 : vector<8x16x4xbf16> to vector<128x4xbf16>
    %c1 = arith.constant 1 : index
    %c0_6 = arith.constant 0 : index
    %c0_7 = arith.constant 0 : index
    %15 = vector.load %arg3[%c1, %c0_6, %c0_7] : memref<9x4x128xbf16, #tpu.memory_space<vmem>>, vector<1x4x128xbf16>
    %16 = vector.shape_cast %15 : vector<1x4x128xbf16> to vector<4x128xbf16>
    %cst_8 = arith.constant dense<0.000000e+00> : vector<128x128xf32>
    %17 = tpu.matmul %14, %16, %cst_8 {dimension_numbers = #tpu.dot_dimension_numbers<[1], [0], [0], [1], [0, 0, 1, 1], [], []>} : vector<128x4xbf16>, vector<4x128xbf16>, vector<128x128xf32> -> vector<128x128xf32>
    %18 = arith.addf %12, %17 : vector<128x128xf32>
    %19 = vector.extract_strided_slice %6 {offsets = [0, 2, 0], sizes = [8, 16, 4], strides = [1, 1, 1]} : vector<8x18x4xbf16> to vector<8x16x4xbf16>
    %20 = vector.shape_cast %19 : vector<8x16x4xbf16> to vector<128x4xbf16>
    %c2 = arith.constant 2 : index
    %c0_9 = arith.constant 0 : index
    %c0_10 = arith.constant 0 : index
    %21 = vector.load %arg3[%c2, %c0_9, %c0_10] : memref<9x4x128xbf16, #tpu.memory_space<vmem>>, vector<1x4x128xbf16>
    %22 = vector.shape_cast %21 : vector<1x4x128xbf16> to vector<4x128xbf16>
    %cst_11 = arith.constant dense<0.000000e+00> : vector<128x128xf32>
    %23 = tpu.matmul %20, %22, %cst_11 {dimension_numbers = #tpu.dot_dimension_numbers<[1], [0], [0], [1], [0, 0, 1, 1], [], []>} : vector<128x4xbf16>, vector<4x128xbf16>, vector<128x128xf32> -> vector<128x128xf32>
    %24 = arith.addf %18, %23 : vector<128x128xf32>
    %c1_i32 = arith.constant 1 : i32
    %25 = arith.addi %1, %c1_i32 : i32
    %c0_12 = arith.constant 0 : index
    %26 = arith.index_cast %25 : i32 to index
    %c0_13 = arith.constant 0 : index
    %c0_14 = arith.constant 0 : index
    %27 = vector.load %arg2[%c0_12, %26, %c0_13, %c0_14] : memref<1x18x18x4xbf16, #tpu.memory_space<vmem>>, vector<1x8x18x4xbf16>
    %28 = vector.shape_cast %27 : vector<1x8x18x4xbf16> to vector<8x18x4xbf16>
    %29 = vector.extract_strided_slice %28 {offsets = [0, 0, 0], sizes = [8, 16, 4], strides = [1, 1, 1]} : vector<8x18x4xbf16> to vector<8x16x4xbf16>
    %30 = vector.shape_cast %29 : vector<8x16x4xbf16> to vector<128x4xbf16>
    %c3 = arith.constant 3 : index
    %c0_15 = arith.constant 0 : index
    %c0_16 = arith.constant 0 : index
    %31 = vector.load %arg3[%c3, %c0_15, %c0_16] : memref<9x4x128xbf16, #tpu.memory_space<vmem>>, vector<1x4x128xbf16>
    %32 = vector.shape_cast %31 : vector<1x4x128xbf16> to vector<4x128xbf16>
    %cst_17 = arith.constant dense<0.000000e+00> : vector<128x128xf32>
    %33 = tpu.matmul %30, %32, %cst_17 {dimension_numbers = #tpu.dot_dimension_numbers<[1], [0], [0], [1], [0, 0, 1, 1], [], []>} : vector<128x4xbf16>, vector<4x128xbf16>, vector<128x128xf32> -> vector<128x128xf32>
    %34 = arith.addf %24, %33 : vector<128x128xf32>
    %35 = vector.extract_strided_slice %28 {offsets = [0, 1, 0], sizes = [8, 16, 4], strides = [1, 1, 1]} : vector<8x18x4xbf16> to vector<8x16x4xbf16>
    %36 = vector.shape_cast %35 : vector<8x16x4xbf16> to vector<128x4xbf16>
    %c4 = arith.constant 4 : index
    %c0_18 = arith.constant 0 : index
    %c0_19 = arith.constant 0 : index
    %37 = vector.load %arg3[%c4, %c0_18, %c0_19] : memref<9x4x128xbf16, #tpu.memory_space<vmem>>, vector<1x4x128xbf16>
    %38 = vector.shape_cast %37 : vector<1x4x128xbf16> to vector<4x128xbf16>
    %cst_20 = arith.constant dense<0.000000e+00> : vector<128x128xf32>
    %39 = tpu.matmul %36, %38, %cst_20 {dimension_numbers = #tpu.dot_dimension_numbers<[1], [0], [0], [1], [0, 0, 1, 1], [], []>} : vector<128x4xbf16>, vector<4x128xbf16>, vector<128x128xf32> -> vector<128x128xf32>
    %40 = arith.addf %34, %39 : vector<128x128xf32>
    %41 = vector.extract_strided_slice %28 {offsets = [0, 2, 0], sizes = [8, 16, 4], strides = [1, 1, 1]} : vector<8x18x4xbf16> to vector<8x16x4xbf16>
    %42 = vector.shape_cast %41 : vector<8x16x4xbf16> to vector<128x4xbf16>
    %c5 = arith.constant 5 : index
    %c0_21 = arith.constant 0 : index
    %c0_22 = arith.constant 0 : index
    %43 = vector.load %arg3[%c5, %c0_21, %c0_22] : memref<9x4x128xbf16, #tpu.memory_space<vmem>>, vector<1x4x128xbf16>
    %44 = vector.shape_cast %43 : vector<1x4x128xbf16> to vector<4x128xbf16>
    %cst_23 = arith.constant dense<0.000000e+00> : vector<128x128xf32>
    %45 = tpu.matmul %42, %44, %cst_23 {dimension_numbers = #tpu.dot_dimension_numbers<[1], [0], [0], [1], [0, 0, 1, 1], [], []>} : vector<128x4xbf16>, vector<4x128xbf16>, vector<128x128xf32> -> vector<128x128xf32>
    %46 = arith.addf %40, %45 : vector<128x128xf32>
    %c2_i32 = arith.constant 2 : i32
    %47 = arith.addi %1, %c2_i32 : i32
    %c0_24 = arith.constant 0 : index
    %48 = arith.index_cast %47 : i32 to index
    %c0_25 = arith.constant 0 : index
    %c0_26 = arith.constant 0 : index
    %49 = vector.load %arg2[%c0_24, %48, %c0_25, %c0_26] : memref<1x18x18x4xbf16, #tpu.memory_space<vmem>>, vector<1x8x18x4xbf16>
    %50 = vector.shape_cast %49 : vector<1x8x18x4xbf16> to vector<8x18x4xbf16>
    %51 = vector.extract_strided_slice %50 {offsets = [0, 0, 0], sizes = [8, 16, 4], strides = [1, 1, 1]} : vector<8x18x4xbf16> to vector<8x16x4xbf16>
    %52 = vector.shape_cast %51 : vector<8x16x4xbf16> to vector<128x4xbf16>
    %c6 = arith.constant 6 : index
    %c0_27 = arith.constant 0 : index
    %c0_28 = arith.constant 0 : index
    %53 = vector.load %arg3[%c6, %c0_27, %c0_28] : memref<9x4x128xbf16, #tpu.memory_space<vmem>>, vector<1x4x128xbf16>
    %54 = vector.shape_cast %53 : vector<1x4x128xbf16> to vector<4x128xbf16>
    %cst_29 = arith.constant dense<0.000000e+00> : vector<128x128xf32>
    %55 = tpu.matmul %52, %54, %cst_29 {dimension_numbers = #tpu.dot_dimension_numbers<[1], [0], [0], [1], [0, 0, 1, 1], [], []>} : vector<128x4xbf16>, vector<4x128xbf16>, vector<128x128xf32> -> vector<128x128xf32>
    %56 = arith.addf %46, %55 : vector<128x128xf32>
    %57 = vector.extract_strided_slice %50 {offsets = [0, 1, 0], sizes = [8, 16, 4], strides = [1, 1, 1]} : vector<8x18x4xbf16> to vector<8x16x4xbf16>
    %58 = vector.shape_cast %57 : vector<8x16x4xbf16> to vector<128x4xbf16>
    %c7 = arith.constant 7 : index
    %c0_30 = arith.constant 0 : index
    %c0_31 = arith.constant 0 : index
    %59 = vector.load %arg3[%c7, %c0_30, %c0_31] : memref<9x4x128xbf16, #tpu.memory_space<vmem>>, vector<1x4x128xbf16>
    %60 = vector.shape_cast %59 : vector<1x4x128xbf16> to vector<4x128xbf16>
    %cst_32 = arith.constant dense<0.000000e+00> : vector<128x128xf32>
    %61 = tpu.matmul %58, %60, %cst_32 {dimension_numbers = #tpu.dot_dimension_numbers<[1], [0], [0], [1], [0, 0, 1, 1], [], []>} : vector<128x4xbf16>, vector<4x128xbf16>, vector<128x128xf32> -> vector<128x128xf32>
    %62 = arith.addf %56, %61 : vector<128x128xf32>
    %63 = vector.extract_strided_slice %50 {offsets = [0, 2, 0], sizes = [8, 16, 4], strides = [1, 1, 1]} : vector<8x18x4xbf16> to vector<8x16x4xbf16>
    %64 = vector.shape_cast %63 : vector<8x16x4xbf16> to vector<128x4xbf16>
    %c8 = arith.constant 8 : index
    %c0_33 = arith.constant 0 : index
    %c0_34 = arith.constant 0 : index
    %65 = vector.load %arg3[%c8, %c0_33, %c0_34] : memref<9x4x128xbf16, #tpu.memory_space<vmem>>, vector<1x4x128xbf16>
    %66 = vector.shape_cast %65 : vector<1x4x128xbf16> to vector<4x128xbf16>
    %cst_35 = arith.constant dense<0.000000e+00> : vector<128x128xf32>
    %67 = tpu.matmul %64, %66, %cst_35 {dimension_numbers = #tpu.dot_dimension_numbers<[1], [0], [0], [1], [0, 0, 1, 1], [], []>} : vector<128x4xbf16>, vector<4x128xbf16>, vector<128x128xf32> -> vector<128x128xf32>
    %68 = arith.addf %62, %67 : vector<128x128xf32>
    %cst_36 = arith.constant dense<0.000000e+00> : vector<128xf32>
    %69 = vector.multi_reduction <add>, %68, %cst_36 [0] : vector<128x128xf32> to vector<128xf32>
    %70 = vector.shape_cast %69 : vector<128xf32> to vector<1x128xf32>
    %c0_37 = arith.constant 0 : index
    %c0_38 = arith.constant 0 : index
    %c0_39 = arith.constant 0 : index
    %c0_40 = arith.constant 0 : index
    %71 = vector.load %arg4[%c0_37, %c0_38, %c0_39, %c0_40] : memref<1x1x2x128xf32, #tpu.memory_space<vmem>>, vector<1x1x1x128xf32>
    %72 = vector.shape_cast %71 : vector<1x1x1x128xf32> to vector<1x128xf32>
    %73 = vector.shape_cast %70 : vector<1x128xf32> to vector<1x1x1x128xf32>
    tpu.vector_store %arg4[%c0_37, %c0_38, %c0_39, %c0_40], %73 {strides = array<i32>} : memref<1x1x2x128xf32, #tpu.memory_space<vmem>>, vector<1x1x1x128xf32>,
    %74 = arith.mulf %68, %68 : vector<128x128xf32>
    %cst_41 = arith.constant dense<0.000000e+00> : vector<128xf32>
    %75 = vector.multi_reduction <add>, %74, %cst_41 [0] : vector<128x128xf32> to vector<128xf32>
    %76 = vector.shape_cast %75 : vector<128xf32> to vector<1x128xf32>
    %c0_42 = arith.constant 0 : index
    %c0_43 = arith.constant 0 : index
    %c1_44 = arith.constant 1 : index
    %c0_45 = arith.constant 0 : index
    %77 = vector.load %arg4[%c0_42, %c0_43, %c1_44, %c0_45] : memref<1x1x2x128xf32, #tpu.memory_space<vmem>>, vector<1x1x1x128xf32>
    %78 = vector.shape_cast %77 : vector<1x1x1x128xf32> to vector<1x128xf32>
    %79 = vector.shape_cast %76 : vector<1x128xf32> to vector<1x1x1x128xf32>
    tpu.vector_store %arg4[%c0_42, %c0_43, %c1_44, %c0_45], %79 {strides = array<i32>} : memref<1x1x2x128xf32, #tpu.memory_space<vmem>>, vector<1x1x1x128xf32>,
    return
  }
  func.func @transform_0(%arg0: i32, %arg1: i32) -> (i32, i32, i32, i32) {
    %c0_i32 = arith.constant 0 : i32
    %c0_i32_0 = arith.constant 0 : i32
    %c0_i32_1 = arith.constant 0 : i32
    %c0_i32_2 = arith.constant 0 : i32
    return %arg0, %c0_i32, %c0_i32_0, %c0_i32_1 : i32, i32, i32, i32
  }
  func.func @transform_1(%arg0: i32, %arg1: i32) -> (i32, i32, i32) {
    %c0_i32 = arith.constant 0 : i32
    %c0_i32_0 = arith.constant 0 : i32
    %c0_i32_1 = arith.constant 0 : i32
    %c0_i32_2 = arith.constant 0 : i32
    return %c0_i32, %c0_i32_0, %c0_i32_1 : i32, i32, i32
  }
  func.func @transform_2(%arg0: i32, %arg1: i32) -> (i32, i32, i32, i32) {
    %c0_i32 = arith.constant 0 : i32
    %c0_i32_0 = arith.constant 0 : i32
    %c0_i32_1 = arith.constant 0 : i32
    return %arg0, %arg1, %c0_i32, %c0_i32_0 : i32, i32, i32, i32
  }
}

</mosaic_0001>

<bundles_post_ra>
// kernel: tpu_custom_call.1
= control target key start
LH: loop header
LB: loop body
LE: loop exit
PB: predicated region body
PF: predicated region fallthrough
CT: control target
= control target key end

     0   :  { %7 = vsyncpa [#allocation3], 0  ;;  %s4659_s0 = inlined_call_operand.vmem [shape: bf16[2,18,18,4], index: 0, kind: input, shape index: {}]   ;;  %s4660_s1 = inlined_call_operand.vmem [shape: bf16[9,4,128], index: 1, kind: input, shape index: {}]   ;;  %s4661_s2 = inlined_call_operand.hbm [shape: f32[2,2,2,128], index: 2, kind: output, shape index: {}]  }
   0x1   :  { %9 = vsyncpa [#allocation3 + $0x1], 0  ;;  %s3389_s9 = smov 0   ;;  %s3391_s10 = smov 0  }
   0x2   :  { %s3393_s11 = smov 0   ;;  %s3395_s12 = smov 0  }
   0x3   :  { %s3397_s13 = smov 0   ;;  %s3399_s14 = smov 0  }
   0x4   :  { %s3401_s15 = smov 0   ;;  %s3403_s16 = smov 0  }
   0x5 LB: > { %s2684_s17 = sadd.s32 4294967295, %s3371_s16   ;;  %s2685_s18 = sadd.s32 4294967294, %s3371_s16   ;;  %s3371_s16 = sphi %s3403_s16, %s15_s16   ;;  %s3367_s15 = sphi %s3401_s15, %s4717_s15   ;;  %s3363_s14 = sphi %s3399_s14, %s4716_s14   ;;  %s3359_s13 = sphi %s3397_s13, %s4715_s13   ;;  %s3355_s12 = sphi %s3395_s12, %s4714_s12   ;;  %s3351_s11 = sphi %s3393_s11, %s4713_s11   ;;  %s3347_s10 = sphi %s3391_s10, %s4712_s10   ;;  %s3343_s9 = sphi %s3389_s9, %s4711_s9  }
   0x6   : > { %s24_s19 = sadd.s32 1, %s3363_s14  ;;  %s27_s20 = sadd.s32 1, %s3367_s15 }
   0x7   : > { %p25_p0 = scmp.ge.s32.totalorder %s24_s19, 2  ;;  %p93_p1 = scmp.ne.s32.totalorder %s3351_s11, %s3347_s10 }
   0x8   : > { %p94_p2 = scmp.eq.s32.totalorder %s2684_s17, 3  ;;  %p99_p5 = scmp.ne.s32.totalorder %s3347_s10, %s3343_s9 }
   0x9   : > { %s4719_s19 = smov (%p25_p0, %s24_s19), 0  ;;  %s4721_s20 = smov (!%p25_p0, %s27_s20), %s3367_s15 }
   0xa   : > { %s79_s21 = ssub.s32 %s3363_s14, %s4719_s19  ;;  %p3440_p3 = por %p94_p2, %p93_p1 }
   0xb   : > { %p29_p4 = scmp.ge.s32.totalorder %s4721_s20, 2  ;;  %p100_p6 = scmp.eq.s32.totalorder %s2685_s18, 3 }
   0xc   : > { %p2688_p7 = scmp.ge.s32.totalorder %s3371_s16, 1  ;;  %p129_p9 = scmp.lt.s32.totalorder %s3371_s16, 5 }
   0xd   : > { %s4723_s20 = smov (%p29_p4, %s4721_s20), 0  ;;  %p3449_p8 = por %p100_p6, %p99_p5 }
   0xe   : > { %s78_s24 = ssub.s32 %s3367_s15, %s4723_s20  ;;  %s83_s25 = sadd.s32 1, %s3351_s11 }
   0xf   : > { %s80_s26 = sor.u32 %s79_s21, %s78_s24  ;;  %p130_p10 = pnand %p2688_p7, %p129_p9 }
  0x10   : > { %p81_p11 = scmp.eq.s32.totalorder %s80_s26, 0 }
  0x11   : > { %133 = sbr.rel (%p130_p10) target bundleno = 435 (0x1b3), region = 28 }
  0x12   : > { %s3458_s27 = scalar_select %p81_p11, %s3351_s11, %s83_s25  }
  0x16   : > { %v2694_v0 = vld [vmem:[%s4660_s1 + $0x2] sm:$0x3]  ;;  %vm432_vm0 = vcmask 1041408   ;;  %p151_p12 = scmp.lt.s32.totalorder %s3359_s13, 1  ;;  %v185_v2 = vld [vmem:[%s4660_s1] sm:$0x3] }
  0x17   : > { %3174 = vmatprep.subr.msk.bf16.mxu1 %vm432_vm0, %v2694_v0  ;;  %3173 = vmatprep.subr.msk.bf16.mxu0 %vm432_vm0, %v2694_v0  ;;  %v434_v1 = vsel %vm432_vm0, %v2694_v0, 0  ;;  %v2735_v3 = vld [vmem:[%s4660_s1 + $0x4] sm:$0x3]  ;;  %s2927_s7 = smul.u32 96, %s3355_s12  ;;  %vm186_vm1 = vsmask.f32 3328 }
  0x18   : > { %3172 = vmatpush3.bf16.msra.mxu1 %v434_v1  ;;  %3010 = vmatpush3.bf16.msra.mxu0 %v434_v1  ;;  %s152_s30 = scalar_select %p151_p12, %s3359_s13, 1  ;;  %vm187_vm2 = vsmask.f32 7440  ;;  %vm407_vm3 = vcmask 31744   ;;  %v3506_v15 = vsel %vm432_vm0, %v185_v2, 0  ;;  %v3526_v34 = vsel %vm432_vm0, %v2735_v3, 0 }
  0x19   : > { %3175 = vmatprep.subr.msk.bf16.mxu1 %vm432_vm0, %v185_v2  ;;  %3176 = vmatprep.subr.msk.bf16.mxu0 %vm432_vm0, %v2735_v3  ;;  %vm3521_vm4 = vmor %vm186_vm1, %vm187_vm2  ;;  %vm705_vm5 = vcmask 1042432   ;;  %vm706_vm6 = vcmask 1046532   ;;  %s148_s18 = sand.u32 1, %s3347_s10  }
  0x1a   : > { %s3183_s8 = smul.u32 216, %s152_s30  ;;  %vm3655_vm7 = vmor %vm705_vm5, %vm706_vm6 }
  0x1c   : > { %s155_s21 = scalar_lea.vmem %s4659_s0, %s3183_s8 }
  0x1d   : > { %s3480_s24 = scalar_lea.vmem %s155_s21, %s2927_s7  ;;  %s2689_s21 = sshll.u32 %s148_s18, 1 }
  0x1e   : > { %v3483_v4 = vld [vmem:[%s3480_s24] sm:$0xf]  ;;  %v3486_v5 = vld [vmem:[%s3480_s24 + $0x4] sm:$0xf]  ;;  %v3489_v6 = vld [vmem:[%s3480_s24 + $0x8] sm:$0x1] }
  0x1f   : > { %v190_v7 = vshrl.u32 %v3483_v4, 16  ;;  %v193_v8 = vshll.u32 %v3483_v4, 16  ;;  %v199_v9 = vshll.u32 %v3486_v5, 16  ;;  %v203_v10 = vshrl.u32 %v3486_v5, 16  ;;  %v3496_v11 = vld [vmem:[%s3480_s24 + $0x30] sm:$0xf] }
  0x20   : > { %v209_v12 = vshll.u32 %v3489_v6, 16  ;;  %v3500_v13 = vld [vmem:[%s3480_s24 + $0x34] sm:$0xf]  ;;  %v3503_v14 = vld [vmem:[%s3480_s24 + $0x38] sm:$0x1]  ;;  %v286_v21 = vshrl.u32 %v3496_v11, 16 }
  0x21   : > { %v192_v16 = vrot.slane %v190_v7, 4  ;;  %v195_v17 = vrot.slane %v193_v8, 5  ;;  %v201_v18 = vrot.slane %v199_v9, 5  ;;  %v205_v19 = vrot.slane %v203_v10, 4  ;;  %v3514_v28 = vld [vmem:[%s3480_s24 + $0xc] sm:$0xf] }
  0x22   : > { %v211_v20 = vrot.slane %v209_v12, 5  ;;  %v289_v22 = vshll.u32 %v3496_v11, 16  ;;  %v295_v23 = vshll.u32 %v3500_v13, 16  ;;  %v299_v26 = vshrl.u32 %v3500_v13, 16  ;;  %v3517_v29 = vld [vmem:[%s3480_s24 + $0x10] sm:$0xf] }
  0x23   : > { %v196_v24 = vor.u32 %v195_v17, %v192_v16  ;;  %v206_v25 = vor.u32 %v205_v19, %v201_v18  ;;  %v305_v27 = vshll.u32 %v3503_v14, 16  ;;  %v288_v31 = vrot.slane %v286_v21, 4  ;;  %v3529_v40 = vld [vmem:[%s3480_s24 + $0x14] sm:$0x1]  ;;  %v3540_v52 = vld [vmem:[%s3480_s24 + $0x3c] sm:$0xf] }
  0x24   : > { %v291_v32 = vrot.slane %v289_v22, 5  ;;  %v297_v33 = vrot.slane %v295_v23, 5  ;;  %v301_v37 = vrot.slane %v299_v26, 4  ;;  %v214_v41 = vshrl.u32 %v3514_v28, 16  ;;  %v3544_v57 = vld [vmem:[%s3480_s24 + $0x40] sm:$0xf] }
  0x25   : > { %v197_v35 = vrot.slane %v196_v24, 4  ;;  %v207_v36 = vrot.slane %v206_v25, 4  ;;  %v307_v38 = vrot.slane %v305_v27, 5  ;;  %v217_v42 = vshll.u32 %v3514_v28, 16  ;;  %v3552_v62 = vld [vmem:[%s3480_s24 + $0x44] sm:$0x1] }
  0x26   : > { %v292_v39 = vor.u32 %v291_v32, %v288_v31  ;;  %v223_v43 = vshll.u32 %v3517_v29, 16  ;;  %v302_v46 = vor.u32 %v301_v37, %v297_v33  ;;  %v227_v47 = vshrl.u32 %v3517_v29, 16  ;;  %v3558_v3 = vld [vmem:[%s3480_s24 + $0x18] sm:$0xf]  ;;  %v3565_v19 = vld [vmem:[%s3480_s24 + $0x1c] sm:$0xf] }
  0x27   : > { %v202_v44 = vsel %vm3521_vm4, %v197_v35, %v201_v18  ;;  %v212_v45 = vsel %vm3521_vm4, %v207_v36, %v211_v20  ;;  %v216_v50 = vrot.slane %v214_v41, 4  ;;  %v219_v51 = vrot.slane %v217_v42, 5  ;;  %v3571_v23 = vld [vmem:[%s3480_s24 + $0x20] sm:$0x1]  ;;  %v3578_v32 = vld [vmem:[%s3480_s24 + $0x48] sm:$0xf] }
  0x28   : > { %v2695_v48 = vcombine.low %v202_v44, %v212_v45  ;;  %v293_v49 = vrot.slane %v292_v39, 4  ;;  %v303_v53 = vrot.slane %v302_v46, 4  ;;  %v225_v54 = vrot.slane %v223_v43, 5  ;;  %v3589_v44 = vld [vmem:[%s3480_s24 + $0x4c] sm:$0xf]  ;;  %s150_s28 = scalar_lea.vmem [#allocation2], %s2689_s21 }
  0x29   : > { %v229_v55 = vrot.slane %v227_v47, 4  ;;  %v233_v56 = vshll.u32 %v3529_v40, 16  ;;  %v713_v58 = vrot.slane %v3489_v6, 5  ;;  %v220_v60 = vor.u32 %v219_v51, %v216_v50  ;;  %s2602_s29 = sshll.u32 %s150_s28, 4  ;;  %s2603_s29 = int_to_ptr.vmem [resolvable:$true] %s2602_s29 }
  0x2a   : > { %3011 = vmatprep.mubr.msk.bf16.mxu0 %vm407_vm3, %v2695_v48  ;;  %v298_v59 = vsel %vm3521_vm4, %v293_v49, %v297_v33  ;;  %v717_v61 = vrot.slane %v3517_v29, 5  ;;  %v308_v63 = vsel %vm3521_vm4, %v303_v53, %v307_v38  ;;  %v310_v2 = vshrl.u32 %v3540_v52, 16  ;;  %v3584_v38 = vld [vmem:[%s4660_s1 + $0x8] sm:$0x3]  ;;  %s3279_s5 = scalar_lea.vmem %s2603_s29, 32 }
  0x2b   : > { %v230_v0 = vor.u32 %v229_v55, %v225_v54  ;;  %v235_v1 = vrot.slane %v233_v56, 5  ;;  %v2699_v7 = vcombine.low %v298_v59, %v308_v63  ;;  %v221_v8 = vrot.slane %v220_v60, 4  ;;  %v3602_v63 = vld [vmem:[%s3480_s24 + $0x24] sm:$0xf]  ;;  %p3280_p13 = scmp.ne.s32.totalorder %s2603_s29, %s3279_s5 }
  0x2c   : > { %v313_v9 = vshll.u32 %v3540_v52, 16  ;;  %v319_v10 = vshll.u32 %v3544_v57, 16  ;;  %v312_v16 = vrot.slane %v310_v2, 4  ;;  %v323_v17 = vshrl.u32 %v3544_v57, 16 }
  0x2d   : > { %v231_v12 = vrot.slane %v230_v0, 4  ;;  %v329_v18 = vshll.u32 %v3552_v62, 16  ;;  %3019 = vmatprep.mubr.msk.bf16.mxu1 %vm407_vm3, %v2699_v7  ;;  %v226_v20 = vsel %vm3521_vm4, %v221_v8, %v225_v54  ;;  %v238_v24 = vshrl.u32 %v3558_v3, 16  ;;  %v3596_v54 = vld [vmem:[%s3480_s24 + $0x50] sm:$0x1]  ;;  %p3281_p0 = pnand %p3280_p13, %p3440_p3 }
  0x2e   : > { %v315_v21 = vrot.slane %v313_v9, 5  ;;  %v321_v22 = vrot.slane %v319_v10, 5  ;;  %v325_v26 = vrot.slane %v323_v17, 4  ;;  %v241_v31 = vshll.u32 %v3558_v3, 16  ;;  %v3610_v7 = vld [vmem:[%s3480_s24 + $0x28] sm:$0xf] }
  0x2f   : > { %v236_v25 = vsel %vm3521_vm4, %v231_v12, %v235_v1  ;;  %v331_v27 = vrot.slane %v329_v18, 5  ;;  %v240_v36 = vrot.slane %v238_v24, 4  ;;  %v247_v37 = vshll.u32 %v3565_v19, 16  ;;  %p3282_p1 = pneg %p3281_p0 }
  0x30   : > { %v2696_v33 = vcombine.low %v226_v20, %v236_v25  ;;  %v316_v35 = vor.u32 %v315_v21, %v312_v16  ;;  %v326_v39 = vor.u32 %v325_v26, %v321_v22  ;;  %v243_v41 = vrot.slane %v241_v31, 5  ;;  %v3616_v16 = vld [vmem:[%s4660_s1 + $0x6] sm:$0x3]  ;;  %v3621_v21 = vld [vmem:[%s3480_s24 + $0x2c] sm:$0x1] }
  0x31   : > { %v251_v42 = vshrl.u32 %v3565_v19, 16  ;;  %v257_v43 = vshll.u32 %v3571_v23, 16  ;;  %v249_v46 = vrot.slane %v247_v37, 5  ;;  %v334_v47 = vshrl.u32 %v3578_v32, 16  ;;  %v3628_v31 = vld [vmem:[%s3480_s24 + $0x54] sm:$0xf] }
  0x32   : > { %3012 = vmatmul.mubr.msk.bf16.vlgmr.msra.gmra.mxu0 %vm407_vm3, %v2696_v33  ;;  %v317_v45 = vrot.slane %v316_v35, 4  ;;  %v337_v48 = vshll.u32 %v3578_v32, 16  ;;  %v327_v49 = vrot.slane %v326_v39, 4  ;;  %v244_v50 = vor.u32 %v243_v41, %v240_v36  ;;  %v3635_v39 = vld [vmem:[%s3480_s24 + $0x58] sm:$0xf] }
  0x33   : > { %3046 = vmatpush3.bf16.msra.mxu0 %v3526_v34  ;;  %v253_v51 = vrot.slane %v251_v42, 4  ;;  %v259_v53 = vrot.slane %v257_v43, 5  ;;  %v336_v56 = vrot.slane %v334_v47, 4  ;;  %v343_v60 = vshll.u32 %v3589_v44, 16 }
  0x34   : > { %v322_v55 = vsel %vm3521_vm4, %v317_v45, %v321_v22  ;;  %v339_v59 = vrot.slane %v337_v48, 5  ;;  %3178 = vmatprep.subr.msk.bf16.mxu0 %vm432_vm0, %v3584_v38  ;;  %v332_v34 = vsel %vm3521_vm4, %v327_v49, %v331_v27  ;;  %v245_v0 = vrot.slane %v244_v50, 4  ;;  %v3645_v50 = vld [vmem:[%s3480_s24 + $0x5c] sm:$0x1] }
  0x35   : > { %v254_v1 = vor.u32 %v253_v51, %v249_v46  ;;  %v347_v2 = vshrl.u32 %v3589_v44, 16  ;;  %v2700_v8 = vcombine.low %v322_v55, %v332_v34  ;;  %v345_v10 = vrot.slane %v343_v60, 5 }
  0x36   : > { %v340_v9 = vor.u32 %v339_v59, %v336_v56  ;;  %v353_v12 = vshll.u32 %v3596_v54, 16  ;;  %v250_v17 = vsel %vm3521_vm4, %v245_v0, %v249_v46  ;;  %v262_v22 = vshrl.u32 %v3602_v63, 16 }
  0x37   : > { %v255_v18 = vrot.slane %v254_v1, 4  ;;  %v349_v20 = vrot.slane %v347_v2, 4  ;;  %3020 = vmatmul.mubr.msk.bf16.vlgmr.msra.gmra.mxu1 %vm407_vm3, %v2700_v8  ;;  %v265_v26 = vshll.u32 %v3602_v63, 16  ;;  %v271_v27 = vshll.u32 %v3610_v7, 16 }
  0x38   : > { %v341_v24 = vrot.slane %v340_v9, 4  ;;  %v355_v25 = vrot.slane %v353_v12, 5  ;;  %3028 = vmatpush3.bf16.msra.mxu1 %v3506_v15  ;;  %v264_v36 = vrot.slane %v262_v22, 4  ;;  %v275_v37 = vshrl.u32 %v3610_v7, 16 }
  0x39   : > { %v260_v33 = vsel %vm3521_vm4, %v255_v18, %v259_v53  ;;  %v350_v35 = vor.u32 %v349_v20, %v345_v10  ;;  %v267_v43 = vrot.slane %v265_v26, 5  ;;  %v273_v45 = vrot.slane %v271_v27, 5  ;;  %3177 = vmatprep.subr.msk.bf16.mxu1 %vm432_vm0, %v3616_v16 }
  0x3a   : > { %v2697_v41 = vcombine.low %v250_v17, %v260_v33  ;;  %v346_v42 = vsel %vm3521_vm4, %v341_v24, %v345_v10  ;;  %v277_v46 = vrot.slane %v275_v37, 4  ;;  %v281_v47 = vshll.u32 %v3621_v21, 16 }
  0x3b   : > { %v351_v15 = vrot.slane %v350_v35, 4  ;;  %v358_v48 = vshrl.u32 %v3628_v31, 16  ;;  %v268_v49 = vor.u32 %v267_v43, %v264_v36  ;;  %v361_v51 = vshll.u32 %v3628_v31, 16 }
  0x3c   : > { %3015 = vmatprep.mubr.msk.bf16.mxu0 %vm407_vm3, %v2697_v41  ;;  %v367_v53 = vshll.u32 %v3635_v39, 16  ;;  %v371_v55 = vshrl.u32 %v3635_v39, 16  ;;  %v278_v59 = vor.u32 %v277_v46, %v273_v45  ;;  %v283_v60 = vrot.slane %v281_v47, 5 }
  0x3d   : > { %v356_v56 = vsel %vm3521_vm4, %v351_v15, %v355_v25  ;;  %v360_v34 = vrot.slane %v358_v48, 4  ;;  %v269_v1 = vrot.slane %v268_v49, 4  ;;  %v363_v2 = vrot.slane %v361_v51, 5 }
  0x3e   : > { %v2701_v0 = vcombine.low %v346_v42, %v356_v56  ;;  %v369_v8 = vrot.slane %v367_v53, 5  ;;  %v279_v9 = vrot.slane %v278_v59, 4  ;;  %v373_v10 = vrot.slane %v371_v55, 4  ;;  %v2820_v59 = vld [vmem:[%s4660_s1 + $0xa] sm:$0x3] }
  0x3f   : > { %v377_v12 = vshll.u32 %v3645_v50, 16  ;;  %v2727_v18 = vrot.slane %v3483_v4, 9  ;;  %v720_v20 = vrot.slane %v3529_v40, 5  ;;  %v274_v22 = vsel %vm3521_vm4, %v269_v1, %v273_v45  ;;  %v2863_v1 = vld [vmem:[%s4660_s1 + $0xc] sm:$0x3] }
  0x40   : > { %3023 = vmatprep.mubr.msk.bf16.mxu1 %vm407_vm3, %v2701_v0  ;;  %v364_v24 = vor.u32 %v363_v2, %v360_v34  ;;  %v710_v25 = vrot.slane %v3486_v5, 5  ;;  %v284_v26 = vsel %vm3521_vm4, %v279_v9, %v283_v60  ;;  %v374_v27 = vor.u32 %v373_v10, %v369_v8 }
  0x41   : > { %v379_v33 = vrot.slane %v377_v12, 5  ;;  %v2728_v35 = vrot.slane %v3514_v28, 9  ;;  %v2698_v36 = vcombine.low %v274_v22, %v284_v26  ;;  %v2711_v43 = vcombine.low %v3483_v4, %v3486_v5 }
  0x42   : > { %v365_v37 = vrot.slane %v364_v24, 4  ;;  %v711_v40 = vsel %vm3655_vm7, %v2727_v18, %v710_v25  ;;  %v712_v41 = vrot.slane %v710_v25, 4  ;;  %v375_v42 = vrot.slane %v374_v27, 4 }
  0x43   : > { %v718_v45 = vsel %vm3655_vm7, %v2728_v35, %v717_v61  ;;  %v719_v15 = vrot.slane %v717_v61, 4  ;;  %3016 = vmatmul.mubr.msk.bf16.gmra.mxu0 %vm407_vm3, %v2698_v36  ;;  %v2729_v4 = vrot.slane %v3558_v3, 9  ;;  %v724_v5 = vrot.slane %v3565_v19, 5 }
  0x44   : > { %v370_v46 = vsel %vm3521_vm4, %v365_v37, %v369_v8  ;;  %v714_v47 = vsel %vm3655_vm7, %v712_v41, %v713_v58  ;;  %v380_v48 = vsel %vm3521_vm4, %v375_v42, %v379_v33  ;;  %v727_v51 = vrot.slane %v3571_v23, 5 }
  0x45   : > { %v2736_v49 = vcombine.low %v711_v40, %v714_v47  ;;  %v721_v61 = vsel %vm3655_vm7, %v719_v15, %v720_v20  ;;  %v2702_v53 = vcombine.low %v370_v46, %v380_v48  ;;  %v725_v6 = vsel %vm3655_vm7, %v2729_v4, %v724_v5  ;;  %v3749_v40 = vld [vmem:[%s3480_s24 + $0x10] sm:$0xf] }
  0x46   : > { %v726_v55 = vrot.slane %v724_v5, 4  ;;  %v2737_v58 = vcombine.low %v718_v45, %v721_v61  ;;  %v731_v56 = vrot.slane %v3610_v7, 5  ;;  %v2730_v23 = vrot.slane %v3602_v63, 9  ;;  %v3773_v5 = vld [vmem:[%s3480_s24 + $0x18] sm:$0xf] }
  0x47   : > { %3047 = vmatprep.mubr.msk.bf16.mxu0 %vm407_vm3, %v2736_v49  ;;  %3024 = vmatmul.mubr.msk.bf16.gmra.mxu1 %vm407_vm3, %v2702_v53  ;;  %v734_v34 = vrot.slane %v3621_v21, 5  ;;  %v738_v0 = vrot.slane %v3500_v13, 5  ;;  %v741_v2 = vrot.slane %v3503_v14, 5  ;;  %v2731_v10 = vrot.slane %v3496_v11, 9 }
  0x48   : > { %v728_v60 = vsel %vm3655_vm7, %v726_v55, %v727_v51  ;;  %3029 = vmatprep.mubr.msk.bf16.mxu1 %vm407_vm3, %v2711_v43  ;;  %v733_v9 = vrot.slane %v731_v56, 4  ;;  %v1383_v12 = vsel %vm432_vm0, %v3584_v38, 0  ;;  %v745_v21 = vrot.slane %v3544_v57, 5  ;;  %v3778_v51 = vld [vmem:[%s3480_s24 + $0x1c] sm:$0xf] }
  0x49   : > { %v2738_v8 = vcombine.low %v725_v6, %v728_v60  ;;  %v740_v18 = vrot.slane %v738_v0, 4  ;;  %v1025_v20 = vsel %vm432_vm0, %v3616_v16, 0  ;;  %v2732_v22 = vrot.slane %v3540_v52, 9 }
  0x4a   : > { %v3718_v14 = vsel %vm432_vm0, %v2820_v59, 0  ;;  %v3721_v24 = vsel %vm432_vm0, %v2863_v1, 0  ;;  %v2712_v25 = vcombine.low %v3514_v28, %v3517_v29  ;;  %v2713_v38 = vcombine.low %v3558_v3, %v3565_v19  ;;  %v3739_v3 = vld [vmem:[%s3480_s24 + $0xc] sm:$0xf] }
  0x4b   : > { %3048 = vmatmul.mubr.msk.bf16.vlgmr.msra.gmra.mxu0 %vm407_vm3, %v2737_v58  ;;  %v732_v16 = vsel %vm3655_vm7, %v2730_v23, %v731_v56  ;;  %v735_v26 = vsel %vm3655_vm7, %v733_v9, %v734_v34  ;;  %v739_v27 = vsel %vm3655_vm7, %v2731_v10, %v738_v0  ;;  %v742_v28 = vsel %vm3655_vm7, %v740_v18, %v741_v2  ;;  %v3799_v18 = vld [vmem:[%s3480_s24 + $0x28] sm:$0xf] }
  0x4c   : > { %3082 = vmatpush3.bf16.msra.mxu0 %v1383_v12  ;;  %3051 = vmatprep.mubr.msk.bf16.mxu0 %vm407_vm3, %v2738_v8  ;;  %v747_v29 = vrot.slane %v745_v21, 4  ;;  %v748_v33 = vrot.slane %v3552_v62, 5  ;;  %v2714_v19 = vcombine.low %v3602_v63, %v3610_v7  ;;  %v2715_v35 = vcombine.low %v3496_v11, %v3500_v13  ;;  %v3760_v13 = vld [vmem:[%s3480_s24 + $0x14] sm:$0x1]  ;;  %v3792_v8 = vld [vmem:[%s3480_s24 + $0x24] sm:$0xf] }
  0x4d   : > { %v2716_v36 = vcombine.low %v3540_v52, %v3544_v57  ;;  %v752_v37 = vrot.slane %v3589_v44, 5  ;;  %3180 = vmatprep.subr.msk.bf16.mxu0 %vm432_vm0, %v2863_v1  ;;  %v2739_v41 = vcombine.low %v732_v16, %v735_v26  ;;  %v3754_v62 = vsel %vm3655_vm7, %v2732_v22, %v745_v21  ;;  %v3802_v22 = vld [vmem:[%s3480_s24 + $0x20] sm:$0x1]  ;;  %v3864_v57 = vld [vmem:[%s3480_s24 + $0x48] sm:$0xf] }
  0x4e   : > { %v2717_v63 = vcombine.low %v3578_v32, %v3589_v44  ;;  %v2733_v11 = vrot.slane %v3578_v32, 9  ;;  %v2740_v7 = vcombine.low %v739_v27, %v742_v28  ;;  %v755_v42 = vrot.slane %v3596_v54, 5 }
  0x4f   : > { %3030 = vmatmul.mubr.msk.bf16.vlgmr.msra.gmra.mxu1 %vm407_vm3, %v2712_v25  ;;  %v1141_v43 = vshrl.u32 %v3739_v3, 16  ;;  %v1144_v45 = vshll.u32 %v3739_v3, 16  ;;  %v749_v15 = vsel %vm3655_vm7, %v747_v29, %v748_v33  ;;  %v759_v46 = vrot.slane %v3635_v39, 5 }
  0x50   : > { %3064 = vmatpush3.bf16.msra.mxu1 %v1025_v20  ;;  %3033 = vmatprep.mubr.msk.bf16.mxu1 %vm407_vm3, %v2713_v38  ;;  %v1154_v47 = vshrl.u32 %v3749_v40, 16  ;;  %v1150_v4 = vshll.u32 %v3749_v40, 16  ;;  %v754_v48 = vrot.slane %v752_v37, 4  ;;  %v1160_v61 = vshll.u32 %v3760_v13, 16 }
  0x51   : > { %v1143_v54 = vrot.slane %v1141_v43, 4  ;;  %v1146_v49 = vrot.slane %v1144_v45, 5  ;;  %3179 = vmatprep.subr.msk.bf16.mxu1 %vm432_vm0, %v2820_v59  ;;  %v2718_v53 = vcombine.low %v3628_v31, %v3635_v39  ;;  %v2734_v6 = vrot.slane %v3628_v31, 9  ;;  %v3921_v31 = vld [vmem:[%s4660_s1 + $0x10] sm:$0x3] }
  0x52   : > { %v1152_v55 = vrot.slane %v1150_v4, 5  ;;  %v1156_v58 = vrot.slane %v1154_v47, 4  ;;  %v762_v56 = vrot.slane %v3645_v50, 5  ;;  %v1165_v23 = vshrl.u32 %v3773_v5, 16  ;;  %v3828_v47 = vld [vmem:[%s3480_s24 + $0x34] sm:$0xf] }
  0x53   : > { %3052 = vmatmul.mubr.msk.bf16.gmra.mxu0 %vm407_vm3, %v2739_v41  ;;  %v1147_v60 = vor.u32 %v1146_v49, %v1143_v54  ;;  %v1168_v59 = vshll.u32 %v3773_v5, 16  ;;  %v2741_v34 = vcombine.low %v3754_v62, %v749_v15  ;;  %v1178_v1 = vshrl.u32 %v3778_v51, 16  ;;  %v3814_v41 = vld [vmem:[%s3480_s24 + $0x2c] sm:$0x1]  ;;  %v3818_v62 = vld [vmem:[%s3480_s24 + $0x30] sm:$0xf] }
  0x54   : > { %3055 = vmatprep.mubr.msk.bf16.mxu0 %vm407_vm3, %v2740_v7  ;;  %v1157_v0 = vor.u32 %v1156_v58, %v1152_v55  ;;  %v1174_v2 = vshll.u32 %v3778_v51, 16  ;;  %v753_v50 = vsel %vm3655_vm7, %v2733_v11, %v752_v37  ;;  %v756_v9 = vsel %vm3655_vm7, %v754_v48, %v755_v42 }
  0x55   : > { %v761_v10 = vrot.slane %v759_v46, 4  ;;  %v1162_v12 = vrot.slane %v1160_v61, 5  ;;  %v1148_v21 = vrot.slane %v1147_v60, 4  ;;  %v1167_v25 = vrot.slane %v1165_v23, 4 }
  0x56   : > { %v1158_v20 = vrot.slane %v1157_v0, 4  ;;  %v1170_v38 = vrot.slane %v1168_v59, 5  ;;  %v3805_v16 = vrot.slane %v1174_v2, 5  ;;  %v1180_v26 = vrot.slane %v1178_v1, 4 }
  0x57   : > { %3034 = vmatmul.mubr.msk.bf16.gmra.mxu1 %vm407_vm3, %v2714_v19  ;;  %v1189_v27 = vshrl.u32 %v3792_v8, 16  ;;  %v1192_v28 = vshll.u32 %v3792_v8, 16  ;;  %v2742_v29 = vcombine.low %v753_v50, %v756_v9  ;;  %v760_v33 = vsel %vm3655_vm7, %v2734_v6, %v759_v46  ;;  %v3847_v9 = vld [vmem:[%s3480_s24 + $0x40] sm:$0xf] }
  0x58   : > { %3037 = vmatprep.mubr.msk.bf16.mxu1 %vm407_vm3, %v2715_v35  ;;  %v1202_v37 = vshrl.u32 %v3799_v18, 16  ;;  %v1198_v19 = vshll.u32 %v3799_v18, 16  ;;  %v763_v11 = vsel %vm3655_vm7, %v761_v10, %v762_v56  ;;  %v1184_v7 = vshll.u32 %v3802_v22, 16  ;;  %v3842_v56 = vld [vmem:[%s3480_s24 + $0x3c] sm:$0xf] }
  0x59   : > { %v1191_v42 = vrot.slane %v1189_v27, 4  ;;  %v1194_v43 = vrot.slane %v1192_v28, 5  ;;  %v1153_v35 = vsel %vm3521_vm4, %v1148_v21, %v1152_v55  ;;  %v1171_v45 = vor.u32 %v1170_v38, %v1167_v25  ;;  %v3854_v21 = vld [vmem:[%s3480_s24 + $0x38] sm:$0x1] }
  0x5a   : > { %v3825_v15 = vrot.slane %v1198_v19, 5  ;;  %v1204_v46 = vrot.slane %v1202_v37, 4  ;;  %v1163_v4 = vsel %vm3521_vm4, %v1158_v20, %v1162_v12  ;;  %v1181_v48 = vor.u32 %v1180_v26, %v3805_v16  ;;  %v3876_v37 = vld [vmem:[%s3480_s24 + $0x44] sm:$0x1] }
  0x5b   : > { %3056 = vmatmul.mubr.msk.bf16.gmra.mxu0 %vm407_vm3, %v2741_v34  ;;  %v1208_v54 = vshll.u32 %v3814_v41, 16  ;;  %v1213_v49 = vshrl.u32 %v3818_v62, 16  ;;  %v2779_v61 = vcombine.low %v3739_v3, %v3749_v40  ;;  %v1195_v6 = vor.u32 %v1194_v43, %v1191_v42 }
  0x5c   : > { %3059 = vmatprep.mubr.msk.bf16.mxu0 %vm407_vm3, %v2742_v29  ;;  %v1205_v55 = vor.u32 %v1204_v46, %v3825_v15  ;;  %v1216_v58 = vshll.u32 %v3818_v62, 16  ;;  %v2743_v60 = vcombine.low %v760_v33, %v763_v11  ;;  %v1186_v23 = vrot.slane %v1184_v7, 5  ;;  %v3880_v11 = vld [vmem:[%s3480_s24 + $0x4c] sm:$0xf] }
  0x5d   : > { %v1226_v59 = vshrl.u32 %v3828_v47, 16  ;;  %v1215_v34 = vrot.slane %v1213_v49, 4  ;;  %v2796_v0 = vcombine.low %v1153_v35, %v1163_v4  ;;  %v1172_v1 = vrot.slane %v1171_v45, 4 }
  0x5e   : > { %v1218_v2 = vrot.slane %v1216_v58, 5  ;;  %v1222_v50 = vshll.u32 %v3828_v47, 16  ;;  %v1182_v10 = vrot.slane %v1181_v48, 4  ;;  %v1210_v12 = vrot.slane %v1208_v54, 5 }
  0x5f   : > { %3038 = vmatmul.mubr.msk.bf16.gmra.mxu1 %vm407_vm3, %v2716_v36  ;;  %v1228_v20 = vrot.slane %v1226_v59, 4  ;;  %v1237_v25 = vshrl.u32 %v3842_v56, 16  ;;  %v1196_v38 = vrot.slane %v1195_v6, 4  ;;  %v1206_v26 = vrot.slane %v1205_v55, 4  ;;  %v3898_v55 = vld [vmem:[%s3480_s24 + $0x50] sm:$0x1] }
  0x60   : > { %3041 = vmatprep.mubr.msk.bf16.mxu1 %vm407_vm3, %v2717_v63  ;;  %v1219_v27 = vor.u32 %v1218_v2, %v1215_v34  ;;  %v3861_v52 = vrot.slane %v1222_v50, 5  ;;  %v2780_v36 = vcombine.low %v3773_v5, %v3778_v51  ;;  %v1240_v28 = vshll.u32 %v3842_v56, 16  ;;  %v3903_v59 = vld [vmem:[%s3480_s24 + $0x54] sm:$0xf]  ;;  %v3910_v50 = vld [vmem:[%s3480_s24 + $0x58] sm:$0xf] }
  0x61   : > { %v1250_v29 = vshrl.u32 %v3847_v9, 16  ;;  %v1239_v33 = vrot.slane %v1237_v25, 4  ;;  %v1177_v32 = vsel %vm3521_vm4, %v1172_v1, %v3805_v16  ;;  %v1232_v63 = vshll.u32 %v3854_v21, 16 }
  0x62   : > { %v1229_v44 = vor.u32 %v1228_v20, %v3861_v52  ;;  %v1246_v19 = vshll.u32 %v3847_v9, 16  ;;  %v1187_v7 = vsel %vm3521_vm4, %v1182_v10, %v1186_v23  ;;  %v1242_v42 = vrot.slane %v1240_v28, 5 }
  0x63   : > { %3060 = vmatmul.mubr.msk.bf16.gmra.mxu0 %vm407_vm3, %v2743_v60  ;;  %v1252_v43 = vrot.slane %v1250_v29, 4  ;;  %v1261_v16 = vshrl.u32 %v3864_v57, 16  ;;  %v1201_v35 = vsel %vm3521_vm4, %v1196_v38, %v3825_v15  ;;  %v1211_v45 = vsel %vm3521_vm4, %v1206_v26, %v1210_v12 }
  0x64   : > { %3083 = vmatprep.mubr.msk.bf16.mxu0 %vm407_vm3, %v2796_v0  ;;  %v1220_v46 = vrot.slane %v1219_v27, 4  ;;  %v3892_v4 = vrot.slane %v1246_v19, 5  ;;  %v1243_v48 = vor.u32 %v1242_v42, %v1239_v33  ;;  %v1256_v54 = vshll.u32 %v3876_v37, 16  ;;  %v3934_v33 = vld [vmem:[%s3480_s24 + $0x60] sm:$0xf] }
  0x65   : > { %v1264_v49 = vshll.u32 %v3864_v57, 16  ;;  %v1274_v6 = vshrl.u32 %v3880_v11, 16  ;;  %v1230_v58 = vrot.slane %v1229_v44, 4  ;;  %v1234_v60 = vrot.slane %v1232_v63, 5 }
  0x66   : > { %v1253_v15 = vor.u32 %v1252_v43, %v3892_v4  ;;  %v1270_v23 = vshll.u32 %v3880_v11, 16  ;;  %v2797_v34 = vcombine.low %v1177_v32, %v1187_v7  ;;  %v1263_v0 = vrot.slane %v1261_v16, 4 }
  0x67   : > { %3042 = vmatmul.mubr.msk.bf16.gmra.mxu1 %vm407_vm3, %v2718_v53  ;;  %v1266_v1 = vrot.slane %v1264_v49, 5  ;;  %v1276_v2 = vrot.slane %v1274_v6, 4  ;;  %v2798_v10 = vcombine.low %v1201_v35, %v1211_v45  ;;  %v1225_v12 = vsel %vm3521_vm4, %v1220_v46, %v3861_v52  ;;  %v3946_v35 = vld [vmem:[%s3480_s24 + $0x64] sm:$0xf] }
  0x68   : > { %3065 = vmatprep.mubr.msk.bf16.mxu1 %vm407_vm3, %v2779_v61  ;;  %v1244_v20 = vrot.slane %v1243_v48, 4  ;;  %v3916_v25 = vrot.slane %v1270_v23, 5  ;;  %v1254_v39 = vrot.slane %v1253_v15, 4  ;;  %v1258_v53 = vrot.slane %v1256_v54, 5  ;;  %v3926_v61 = vld [vmem:[%s3480_s24 + $0x5c] sm:$0x1] }
  0x69   : > { %v1285_v38 = vshrl.u32 %v3903_v59, 16  ;;  %v1288_v26 = vshll.u32 %v3903_v59, 16  ;;  %v1235_v27 = vsel %vm3521_vm4, %v1230_v58, %v1234_v60  ;;  %v1280_v52 = vshll.u32 %v3898_v55, 16  ;;  %v2880_v58 = vld [vmem:[%s4660_s1 + $0xe] sm:$0x3] }
  0x6a   : > { %v1298_v28 = vshrl.u32 %v3910_v50, 16  ;;  %v1294_v29 = vshll.u32 %v3910_v50, 16  ;;  %v1267_v32 = vor.u32 %v1266_v1, %v1263_v0  ;;  %v1277_v44 = vor.u32 %v1276_v2, %v3916_v25 }
  0x6b   : > { %3084 = vmatmul.mubr.msk.bf16.vlgmr.msra.gmra.mxu0 %vm407_vm3, %v2797_v34  ;;  %v1287_v63 = vrot.slane %v1285_v38, 4  ;;  %v1290_v19 = vrot.slane %v1288_v26, 5  ;;  %v2781_v7 = vcombine.low %v3792_v8, %v3799_v18  ;;  %v1249_v42 = vsel %vm3521_vm4, %v1244_v20, %v3892_v4 }
  0x6c   : > { %3118 = vmatpush3.bf16.msra.mxu0 %v3721_v24  ;;  %3087 = vmatprep.mubr.msk.bf16.mxu0 %vm407_vm3, %v2798_v10  ;;  %v1296_v43 = vrot.slane %v1294_v29, 5  ;;  %v1300_v16 = vrot.slane %v1298_v28, 4  ;;  %v1259_v45 = vsel %vm3521_vm4, %v1254_v39, %v1258_v53  ;;  %v1304_v48 = vshll.u32 %v3926_v61, 16  ;;  %v3967_v39 = vld [vmem:[%s3480_s24 + $0x68] sm:$0x1] }
  0x6d   : > { %v1291_v46 = vor.u32 %v1290_v19, %v1287_v63  ;;  %v1309_v24 = vshrl.u32 %v3934_v33, 16  ;;  %3182 = vmatprep.subr.msk.bf16.mxu0 %vm432_vm0, %v3921_v31  ;;  %v2799_v54 = vcombine.low %v1225_v12, %v1235_v27  ;;  %v1282_v49 = vrot.slane %v1280_v52, 5 }
  0x6e   : > { %v1301_v6 = vor.u32 %v1300_v16, %v1296_v43  ;;  %v1312_v4 = vshll.u32 %v3934_v33, 16  ;;  %v1268_v60 = vrot.slane %v1267_v32, 4  ;;  %v1278_v15 = vrot.slane %v1277_v44, 4 }
  0x6f   : > { %3066 = vmatmul.mubr.msk.bf16.vlgmr.msra.gmra.mxu1 %vm407_vm3, %v2780_v36  ;;  %v1322_v23 = vshrl.u32 %v3946_v35, 16  ;;  %v1311_v34 = vrot.slane %v1309_v24, 4  ;;  %v2800_v0 = vcombine.low %v1249_v42, %v1259_v45  ;;  %v1318_v2 = vshll.u32 %v3946_v35, 16 }
  0x70   : > { %3100 = vmatpush3.bf16.msra.mxu1 %v3718_v14  ;;  %3069 = vmatprep.mubr.msk.bf16.mxu1 %vm407_vm3, %v2781_v7  ;;  %v1314_v1 = vrot.slane %v1312_v4, 5  ;;  %v1292_v10 = vrot.slane %v1291_v46, 4  ;;  %v1302_v12 = vrot.slane %v1301_v6, 4  ;;  %v1306_v20 = vrot.slane %v1304_v48, 5  ;;  %v4015_v4 = vld [vmem:[%s3480_s24 + $0x24] sm:$0xf] }
  0x71   : > { %v1324_v53 = vrot.slane %v1322_v23, 4  ;;  %3181 = vmatprep.subr.msk.bf16.mxu1 %vm432_vm0, %v2880_v58  ;;  %v2782_v36 = vcombine.low %v3818_v62, %v3828_v47  ;;  %v1320_v38 = vrot.slane %v1318_v2, 5  ;;  %v1273_v14 = vsel %vm3521_vm4, %v1268_v60, %v3916_v25 }
  0x72   : > { %v1283_v26 = vsel %vm3521_vm4, %v1278_v15, %v1282_v49  ;;  %v1315_v27 = vor.u32 %v1314_v1, %v1311_v34  ;;  %v1508_v52 = vrot.slane %v3749_v40, 5  ;;  %v2783_v28 = vcombine.low %v3842_v56, %v3847_v9  ;;  %v4022_v34 = vld [vmem:[%s3480_s24 + $0x28] sm:$0xf] }
  0x73   : > { %3088 = vmatmul.mubr.msk.bf16.gmra.mxu0 %vm407_vm3, %v2799_v54  ;;  %v1325_v29 = vor.u32 %v1324_v53, %v1320_v38  ;;  %v1328_v32 = vshll.u32 %v3967_v39, 16  ;;  %v1297_v44 = vsel %vm3521_vm4, %v1292_v10, %v1296_v43  ;;  %v1307_v25 = vsel %vm3521_vm4, %v1302_v12, %v1306_v20  ;;  %v3997_v54 = vld [vmem:[%s3480_s24 + $0x18] sm:$0xf] }
  0x74   : > { %3091 = vmatprep.mubr.msk.bf16.mxu0 %vm407_vm3, %v2800_v0  ;;  %v2801_v63 = vcombine.low %v1273_v14, %v1283_v26  ;;  %v1316_v40 = vrot.slane %v1315_v27, 4  ;;  %v2812_v19 = vrot.slane %v3739_v3, 9  ;;  %v1510_v7 = vrot.slane %v1508_v52, 4  ;;  %v4000_v3 = vld [vmem:[%s3480_s24 + $0x1c] sm:$0xf] }
  0x75   : > { %v1511_v42 = vrot.slane %v3760_v13, 5  ;;  %v2802_v16 = vcombine.low %v1297_v44, %v1307_v25  ;;  %v1326_v45 = vrot.slane %v1325_v29, 4  ;;  %v1330_v46 = vrot.slane %v1328_v32, 5  ;;  %v4053_v14 = vld [vmem:[%s3480_s24 + $0x34] sm:$0xf] }
  0x76   : > { %v1515_v43 = vrot.slane %v3778_v51, 5  ;;  %v2784_v48 = vcombine.low %v3864_v57, %v3880_v11  ;;  %v2785_v24 = vcombine.low %v3903_v59, %v3910_v50  ;;  %v1321_v13 = vsel %vm3521_vm4, %v1316_v40, %v1320_v38  ;;  %v4050_v38 = vld [vmem:[%s3480_s24 + $0x30] sm:$0xf]  ;;  %v4069_v25 = vld [vmem:[%s3480_s24 + $0x40] sm:$0xf] }
  0x77   : > { %3070 = vmatmul.mubr.msk.bf16.gmra.mxu1 %vm407_vm3, %v2782_v36  ;;  %v4007_v49 = vsel %vm3655_vm7, %v2812_v19, %v1508_v52  ;;  %v4011_v51 = vsel %vm3655_vm7, %v1510_v7, %v1511_v42  ;;  %v2813_v6 = vrot.slane %v3773_v5, 9  ;;  %v1331_v60 = vsel %vm3521_vm4, %v1326_v45, %v1330_v46 }
  0x78   : > { %3073 = vmatprep.mubr.msk.bf16.mxu1 %vm407_vm3, %v2783_v28  ;;  %v1517_v15 = vrot.slane %v1515_v43, 4  ;;  %v1518_v23 = vrot.slane %v3802_v22, 5  ;;  %v1522_v0 = vrot.slane %v3799_v18, 5  ;;  %v2786_v1 = vcombine.low %v3934_v33, %v3946_v35  ;;  %v4063_v28 = vld [vmem:[%s3480_s24 + $0x3c] sm:$0xf] }
  0x79   : > { %v2864_v5 = vcombine.low %v3997_v54, %v4000_v3  ;;  %v4030_v2 = vsel %vm432_vm0, %v2880_v58, 0  ;;  %v4034_v10 = vsel %vm432_vm0, %v3921_v31, 0  ;;  %v1939_v22 = vshrl.u32 %v3997_v54, 16 }
  0x7a   : > { %v1942_v12 = vshll.u32 %v3997_v54, 16  ;;  %v1952_v18 = vshrl.u32 %v4000_v3, 16  ;;  %v1529_v20 = vrot.slane %v3828_v47, 5  ;;  %v2803_v53 = vcombine.low %v1321_v13, %v1331_v60 }
  0x7b   : > { %3092 = vmatmul.mubr.msk.bf16.gmra.mxu0 %vm407_vm3, %v2801_v63  ;;  %v2821_v58 = vcombine.low %v4007_v49, %v4011_v51  ;;  %v4045_v31 = vsel %vm3655_vm7, %v2813_v6, %v1515_v43  ;;  %v2865_v36 = vcombine.low %v4015_v4, %v4022_v34  ;;  %v4058_v47 = vsel %vm3655_vm7, %v1517_v15, %v1518_v23  ;;  %v4095_v43 = vld [vmem:[%s3480_s24 + $0x48] sm:$0xf]  ;;  %v4101_v49 = vld [vmem:[%s3480_s24 + $0x4c] sm:$0xf]  ;;  %v4114_v23 = vld [vmem:[%s3480_s24 + $0x54] sm:$0xf] }
  0x7c   : > { %3095 = vmatprep.mubr.msk.bf16.mxu0 %vm407_vm3, %v2802_v16  ;;  %v2814_v26 = vrot.slane %v3792_v8, 9  ;;  %v1524_v27 = vrot.slane %v1522_v0, 4  ;;  %v1525_v52 = vrot.slane %v3814_v41, 5  ;;  %v1963_v29 = vshrl.u32 %v4015_v4, 16 }
  0x7d   : > { %v1966_v32 = vshll.u32 %v4015_v4, 16  ;;  %v1976_v44 = vshrl.u32 %v4022_v34, 16  ;;  %v1536_v63 = vrot.slane %v3847_v9, 5  ;;  %v2866_v40 = vcombine.low %v4050_v38, %v4053_v14 }
  0x7e   : > { %v2815_v8 = vrot.slane %v3818_v62, 9  ;;  %v1531_v19 = vrot.slane %v1529_v20, 4  ;;  %v1532_v41 = vrot.slane %v3854_v21, 5  ;;  %v2822_v7 = vcombine.low %v4045_v31, %v4058_v47 }
  0x7f   : > { %3074 = vmatmul.mubr.msk.bf16.gmra.mxu1 %vm407_vm3, %v2784_v48  ;;  %v1987_v42 = vshrl.u32 %v4050_v38, 16  ;;  %v1990_v16 = vshll.u32 %v4050_v38, 16  ;;  %v1543_v9 = vrot.slane %v3880_v11, 5  ;;  %v4085_v62 = vsel %vm3655_vm7, %v2814_v26, %v1522_v0 }
  0x80   : > { %3077 = vmatprep.mubr.msk.bf16.mxu1 %vm407_vm3, %v2785_v24  ;;  %v4089_v21 = vsel %vm3655_vm7, %v1524_v27, %v1525_v52  ;;  %v2000_v45 = vshrl.u32 %v4053_v14, 16  ;;  %v2867_v46 = vcombine.low %v4063_v28, %v4069_v25  ;;  %v2011_v11 = vshrl.u32 %v4063_v28, 16  ;;  %v4143_v27 = vld [vmem:[%s3480_s24 + $0x60] sm:$0xf] }
  0x81   : > { %v2816_v48 = vrot.slane %v3842_v56, 9  ;;  %v1538_v24 = vrot.slane %v1536_v63, 4  ;;  %v1539_v13 = vrot.slane %v3876_v37, 5  ;;  %v4105_v51 = vsel %vm3655_vm7, %v2815_v8, %v1529_v20  ;;  %v4117_v56 = vld [vmem:[%s3480_s24 + $0x58] sm:$0xf] }
  0x82   : > { %v4109_v6 = vsel %vm3655_vm7, %v1531_v19, %v1532_v41  ;;  %v2014_v60 = vshll.u32 %v4063_v28, 16  ;;  %v2024_v15 = vshrl.u32 %v4069_v25, 16  ;;  %v2823_v37 = vcombine.low %v4085_v62, %v4089_v21  ;;  %v4149_v41 = vld [vmem:[%s3480_s24 + $0x64] sm:$0xf] }
  0x83   : > { %3096 = vmatmul.mubr.msk.bf16.gmra.mxu0 %vm407_vm3, %v2803_v53  ;;  %v2817_v0 = vrot.slane %v3864_v57, 9  ;;  %v1546_v20 = vrot.slane %v3898_v55, 5  ;;  %v2868_v53 = vcombine.low %v4095_v43, %v4101_v49  ;;  %v2035_v31 = vshrl.u32 %v4095_v43, 16 }
  0x84   : > { %3119 = vmatprep.mubr.msk.bf16.mxu0 %vm407_vm3, %v2864_v5  ;;  %v1545_v5 = vrot.slane %v1543_v9, 4  ;;  %v2038_v47 = vshll.u32 %v4095_v43, 16  ;;  %v2824_v26 = vcombine.low %v4105_v51, %v4109_v6  ;;  %v4134_v57 = vsel %vm3655_vm7, %v2816_v48, %v1536_v63 }
  0x85   : > { %v4138_v55 = vsel %vm3655_vm7, %v1538_v24, %v1539_v13  ;;  %v1550_v19 = vrot.slane %v3910_v50, 5  ;;  %v1948_v63 = vshll.u32 %v4000_v3, 16  ;;  %v4155_v62 = vsel %vm3655_vm7, %v2817_v0, %v1543_v9 }
  0x86   : > { %v4159_v21 = vsel %vm3655_vm7, %v1545_v5, %v1546_v20  ;;  %v2818_v48 = vrot.slane %v3903_v59, 9  ;;  %v1557_v24 = vrot.slane %v3946_v35, 5  ;;  %v2825_v50 = vcombine.low %v4134_v57, %v4138_v55  ;;  %v4185_v57 = vld [vmem:[%s3480_s24 + $0x6c] sm:$0xf] }
  0x87   : > { %3078 = vmatmul.mubr.msk.bf16.gmra.mxu1 %vm407_vm3, %v2786_v1  ;;  %v1941_v9 = vrot.slane %v1939_v22, 4  ;;  %v1944_v13 = vrot.slane %v1942_v12, 5  ;;  %v1553_v59 = vrot.slane %v3926_v61, 5  ;;  %v2870_v35 = vcombine.low %v4143_v27, %v4149_v41 }
  0x88   : > { %3101 = vmatprep.mubr.msk.bf16.mxu1 %vm407_vm3, %v2821_v58  ;;  %v2869_v58 = vcombine.low %v4114_v23, %v4117_v56  ;;  %v4176_v0 = vrot.slane %v1948_v63, 5  ;;  %v2826_v5 = vcombine.low %v4155_v62, %v4159_v21  ;;  %v1552_v20 = vrot.slane %v1550_v19, 4 }
  0x89   : > { %v4190_v61 = vsel %vm3655_vm7, %v2818_v48, %v1550_v19  ;;  %v2819_v55 = vrot.slane %v3934_v33, 9  ;;  %v1559_v63 = vrot.slane %v1557_v24, 4  ;;  %v1945_v22 = vor.u32 %v1944_v13, %v1941_v9 }
  0x8a   : > { %v1965_v33 = vrot.slane %v1963_v29, 4  ;;  %v1972_v48 = vshll.u32 %v4022_v34, 16  ;;  %v2897_v13 = vrot.slane %v3997_v54, 9  ;;  %v2898_v6 = vrot.slane %v4015_v4, 9 }
  0x8b   : > { %3120 = vmatmul.mubr.msk.bf16.vlgmr.msra.gmra.mxu0 %vm407_vm3, %v2865_v36  ;;  %v4195_v36 = vld [vmem:[%s3480_s24 + $0x70] sm:$0xf]  ;;  %v4221_v29 = vsel %vm3655_vm7, %v2819_v55, %v1557_v24  ;;  %v1978_v24 = vrot.slane %v1976_v44, 4  ;;  %v2002_v55 = vrot.slane %v2000_v45, 4  ;;  %v2313_v45 = vrot.slane %v4022_v34, 5 }
  0x8c   : > { %3154 = vmatpush3.bf16.msra.mxu0 %v4034_v10  ;;  %3123 = vmatprep.mubr.msk.bf16.mxu0 %vm407_vm3, %v2866_v40  ;;  %v2841_v10 = vld [vmem:[%s3480_s24 + $0x20] sm:$0x1]  ;;  %v1954_v40 = vrot.slane %v1952_v18, 4  ;;  %v1560_v18 = vrot.slane %v3967_v39, 5  ;;  %v1968_v39 = vrot.slane %v1966_v32, 5  ;;  %v4231_v1 = vrot.slane %v1972_v48, 5 }
  0x8d   : > { %v1958_v8 = vshll.u32 %v2841_v10, 16  ;;  %v2020_v34 = vshll.u32 %v4069_v25, 16  ;;  %v2314_v21 = vsel %vm3655_vm7, %v2898_v6, %v2313_v45 }
  0x8e   : > { %v1955_v19 = vor.u32 %v1954_v40, %v4176_v0  ;;  %v4225_v32 = vsel %vm3655_vm7, %v1559_v63, %v1560_v18  ;;  %v1946_v40 = vrot.slane %v1945_v22, 4  ;;  %v1969_v52 = vor.u32 %v1968_v39, %v1965_v33 }
  0x8f   : > { %3102 = vmatmul.mubr.msk.bf16.vlgmr.msra.gmra.mxu1 %vm407_vm3, %v2822_v7  ;;  %v2306_v7 = vrot.slane %v4000_v3, 5  ;;  %v1996_v3 = vshll.u32 %v4053_v14, 16  ;;  %v2828_v22 = vcombine.low %v4221_v29, %v4225_v32  ;;  %v2016_v33 = vrot.slane %v2014_v60, 5 }
  0x90   : > { %3136 = vmatpush3.bf16.msra.mxu1 %v4030_v2  ;;  %3105 = vmatprep.mubr.msk.bf16.mxu1 %vm407_vm3, %v2823_v37  ;;  %v4209_v2 = vsel %vm3655_vm7, %v1552_v20, %v1553_v59  ;;  %v2871_v37 = vcombine.low %v4185_v57, %v4195_v36  ;;  %v2309_v59 = vrot.slane %v2841_v10, 5  ;;  %v1960_v20 = vrot.slane %v1958_v8, 5 }
  0x91   : > { %v2308_v9 = vrot.slane %v2306_v7, 4  ;;  %v1956_v12 = vrot.slane %v1955_v19, 4  ;;  %v2827_v54 = vcombine.low %v4190_v61, %v4209_v2  ;;  %v2120_v10 = vshrl.u32 %v4195_v36, 16 }
  0x92   : > { %v1992_v8 = vrot.slane %v1990_v16, 5  ;;  %v2307_v44 = vsel %vm3655_vm7, %v2897_v13, %v2306_v7  ;;  %v4250_v61 = vrot.slane %v1996_v3, 5  ;;  %v1970_v18 = vrot.slane %v1969_v52, 4 }
  0x93   : > { %3124 = vmatmul.mubr.msk.bf16.gmra.mxu0 %vm407_vm3, %v2867_v46  ;;  %v2844_v46 = vld [vmem:[%s3480_s24 + $0x2c] sm:$0x1]  ;;  %v2310_v16 = vsel %vm3655_vm7, %v2308_v9, %v2309_v59  ;;  %v1961_v63 = vsel %vm3521_vm4, %v1956_v12, %v1960_v20  ;;  %v1979_v7 = vor.u32 %v1978_v24, %v4231_v1  ;;  %v2320_v19 = vrot.slane %v4053_v14, 5 }
  0x94   : > { %3127 = vmatprep.mubr.msk.bf16.mxu0 %vm407_vm3, %v2868_v53  ;;  %v1989_v53 = vrot.slane %v1987_v42, 4  ;;  %v1951_v42 = vsel %vm3521_vm4, %v1946_v40, %v4176_v0  ;;  %v1982_v51 = vshll.u32 %v2844_v46, 16  ;;  %v2013_v0 = vrot.slane %v2011_v11, 4 }
  0x95   : > { %v2906_v4 = vcombine.low %v2307_v44, %v2310_v16  ;;  %v2003_v52 = vor.u32 %v2002_v55, %v4250_v61  ;;  %v2881_v14 = vcombine.low %v1951_v42, %v1961_v63  ;;  %v2316_v60 = vrot.slane %v2844_v46, 5  ;;  %v2850_v46 = vld [vmem:[%s3480_s24 + $0x44] sm:$0x1] }
  0x96   : > { %v1984_v11 = vrot.slane %v1982_v51, 5  ;;  %v2327_v39 = vrot.slane %v4069_v25, 5  ;;  %v1980_v48 = vrot.slane %v1979_v7, 4  ;;  %v2315_v2 = vrot.slane %v2313_v45, 4 }
  0x97   : > { %3106 = vmatmul.mubr.msk.bf16.gmra.mxu1 %vm407_vm3, %v2824_v26  ;;  %v2847_v26 = vld [vmem:[%s3480_s24 + $0x38] sm:$0x1]  ;;  %v2899_v3 = vrot.slane %v4050_v38, 9  ;;  %v2322_v13 = vrot.slane %v2320_v19, 4  ;;  %v2017_v40 = vor.u32 %v2016_v33, %v2013_v0  ;;  %v4291_v24 = vrot.slane %v2020_v34, 5 }
  0x98   : > { %3109 = vmatprep.mubr.msk.bf16.mxu1 %vm407_vm3, %v2825_v50  ;;  %v1993_v50 = vor.u32 %v1992_v8, %v1989_v53  ;;  %v2006_v12 = vshll.u32 %v2847_v26, 16  ;;  %v2323_v59 = vrot.slane %v2847_v26, 5  ;;  %v2900_v38 = vrot.slane %v4063_v28, 9  ;;  %v2853_v26 = vld [vmem:[%s3480_s24 + $0x50] sm:$0x1] }
  0x99   : > { %v2329_v53 = vrot.slane %v2327_v39, 4  ;;  %v2330_v8 = vrot.slane %v2850_v46, 5  ;;  %v2044_v44 = vshll.u32 %v4101_v49, 16  ;;  %v1985_v62 = vsel %vm3521_vm4, %v1980_v48, %v1984_v11 }
  0x9a   : > { %v1994_v9 = vrot.slane %v1993_v50, 4  ;;  %v2008_v20 = vrot.slane %v2006_v12, 5  ;;  %v2321_v25 = vsel %vm3655_vm7, %v2899_v3, %v2320_v19  ;;  %v2030_v55 = vshll.u32 %v2850_v46, 16 }
  0x9b   : > { %3128 = vmatmul.mubr.msk.bf16.gmra.mxu0 %vm407_vm3, %v2869_v58  ;;  %v1975_v58 = vsel %vm3521_vm4, %v1970_v18, %v4231_v1  ;;  %v2026_v1 = vrot.slane %v2024_v15, 4  ;;  %v2324_v15 = vsel %vm3655_vm7, %v2322_v13, %v2323_v59  ;;  %v2037_v51 = vrot.slane %v2035_v31, 4 }
  0x9c   : > { %3131 = vmatprep.mubr.msk.bf16.mxu0 %vm407_vm3, %v2870_v35  ;;  %v2004_v35 = vrot.slane %v2003_v52, 4  ;;  %v1999_v28 = vsel %vm3521_vm4, %v1994_v9, %v4250_v61  ;;  %v2040_v61 = vrot.slane %v2038_v47, 5  ;;  %v4325_v6 = vsel %vm3655_vm7, %v2900_v38, %v2327_v39 }
  0x9d   : > { %v2027_v16 = vor.u32 %v2026_v1, %v4291_v24  ;;  %v4332_v63 = vrot.slane %v2044_v44, 5  ;;  %v4668_v18 = vshrl.u32 %v4101_v49, 16  ;;  %v2882_v31 = vcombine.low %v1975_v58, %v1985_v62 }
  0x9e   : > { %v2009_v42 = vsel %vm3521_vm4, %v2004_v35, %v2008_v20  ;;  %v2908_v50 = vcombine.low %v2321_v25, %v2324_v15  ;;  %v2334_v47 = vrot.slane %v4101_v49, 5  ;;  %v2032_v33 = vrot.slane %v2030_v55, 5 }
  0x9f   : > { %3110 = vmatmul.mubr.msk.bf16.gmra.mxu1 %vm407_vm3, %v2826_v5  ;;  %v2317_v5 = vsel %vm3655_vm7, %v2315_v2, %v2316_v60  ;;  %v2050_v7 = vrot.slane %v4668_v18, 4  ;;  %v2883_v19 = vcombine.low %v1999_v28, %v2009_v42  ;;  %v2028_v52 = vrot.slane %v2027_v16, 4  ;;  %v2856_v2 = vld [vmem:[%s3480_s24 + $0x5c] sm:$0x1] }
  0xa0   : > { %3113 = vmatprep.mubr.msk.bf16.mxu1 %vm407_vm3, %v2827_v54  ;;  %v2018_v54 = vrot.slane %v2017_v40, 4  ;;  %v2907_v45 = vcombine.low %v2314_v21, %v2317_v5  ;;  %v2041_v34 = vor.u32 %v2040_v61, %v2037_v51  ;;  %v2054_v49 = vshll.u32 %v2853_v26, 16  ;;  %v2859_v21 = vld [vmem:[%s3480_s24 + $0x68] sm:$0x1] }
  0xa1   : > { %v2051_v11 = vor.u32 %v2050_v7, %v4332_v63  ;;  %v2901_v60 = vrot.slane %v4095_v43, 9  ;;  %v2337_v39 = vrot.slane %v2853_v26, 5  ;;  %v2092_v58 = vshll.u32 %v4149_v41, 16 }
  0xa2   : > { %v2023_v0 = vsel %vm3521_vm4, %v2018_v54, %v4291_v24  ;;  %v2336_v48 = vrot.slane %v2334_v47, 4  ;;  %v4669_v29 = vshrl.u32 %v4114_v23, 16  ;;  %v4671_v9 = vshrl.u32 %v4117_v56, 16 }
  0xa3   : > { %3132 = vmatmul.mubr.msk.bf16.gmra.mxu0 %vm407_vm3, %v2871_v37  ;;  %v4329_v37 = vsel %vm3655_vm7, %v2329_v53, %v2330_v8  ;;  %v2341_v59 = vrot.slane %v4117_v56, 5  ;;  %v4672_v43 = vshrl.u32 %v4143_v27, 16  ;;  %v4673_v35 = vshll.u32 %v4143_v27, 16 }
  0xa4   : > { %3155 = vmatprep.mubr.msk.bf16.mxu0 %vm407_vm3, %v2906_v4  ;;  %v2068_v4 = vshll.u32 %v4117_v56, 16  ;;  %v2909_v12 = vcombine.low %v4325_v6, %v4329_v37  ;;  %v2061_v32 = vrot.slane %v4669_v29, 4  ;;  %v2074_v13 = vrot.slane %v4671_v9, 4 }
  0xa5   : > { %v2085_v40 = vrot.slane %v4672_v43, 4  ;;  %v2088_v20 = vrot.slane %v4673_v35, 5  ;;  %v2033_v46 = vsel %vm3521_vm4, %v2028_v52, %v2032_v33  ;;  %v2042_v24 = vrot.slane %v2041_v34, 4 }
  0xa6   : > { %v4368_v1 = vrot.slane %v2092_v58, 5  ;;  %v4674_v38 = vshrl.u32 %v4149_v41, 16  ;;  %v2052_v56 = vrot.slane %v2051_v11, 4  ;;  %v2056_v8 = vrot.slane %v2054_v49, 5 }
  0xa7   : > { %3114 = vmatmul.mubr.msk.bf16.gmra.mxu1 %vm407_vm3, %v2828_v22  ;;  %v4670_v22 = vshll.u32 %v4114_v23, 16  ;;  %v2335_v44 = vsel %vm3655_vm7, %v2901_v60, %v2334_v47  ;;  %v2078_v62 = vshll.u32 %v2856_v2, 16  ;;  %v2338_v5 = vsel %vm3655_vm7, %v2336_v48, %v2337_v39  ;;  %v2862_v60 = vld [vmem:[%s3480_s24 + $0x74] sm:$0x1]  ;;  %s2923_s24 = sshll.u32 %s3359_s13, 1  ;;  %s2587_s13 = scalar_lea.sflag [#allocation3], %s148_s18 }
  0xa8   : > { %3137 = vmatprep.mubr.msk.bf16.mxu1 %vm407_vm3, %v2881_v14  ;;  %v4358_v14 = vrot.slane %v2068_v4, 5  ;;  %v2098_v53 = vrot.slane %v4674_v38, 4  ;;  %v2902_v28 = vrot.slane %v4114_v23, 9  ;;  %v2348_v15 = vrot.slane %v4149_v41, 5  ;;  %s2598_s25 = sadd.s32 %s3355_s12, %s2923_s24  ;;  %s3373_s12 = smov [#allocation2]  }
  0xa9   : > { %v2064_v3 = vrot.slane %v4670_v22, 5  ;;  %v2343_v55 = vrot.slane %v2341_v59, 4  ;;  %v2344_v42 = vrot.slane %v2856_v2, 5  ;;  %v2089_v16 = vor.u32 %v2088_v20, %v2085_v40  ;;  %s2924_s26 = sshll.u32 %s2598_s25, 5  ;;  %s3283_s6 = sshll.u32 %s3373_s12, 4  ;;  %s3284_s6 = int_to_ptr.vmem [resolvable:$false] %s3283_s6 }
  0xaa   : > { %v2075_v54 = vor.u32 %v2074_v13, %v4358_v14  ;;  %v2884_v51 = vcombine.low %v2023_v0, %v2033_v46  ;;  %v2047_v61 = vsel %vm3521_vm4, %v2042_v24, %v4332_v63  ;;  %v2099_v6 = vor.u32 %v2098_v53, %v4368_v1  ;;  %s2600_s4 = scalar_lea.hbm %s4661_s2, %s2924_s26  ;;  %s3285_s7 = scalar_lea.vmem %s3284_s6, 64 }
  0xab   : > { %3156 = vmatmul.mubr.msk.bf16.vlgmr.msra.gmra.mxu0 %vm407_vm3, %v2907_v45  ;;  %v2065_v25 = vor.u32 %v2064_v3, %v2061_v32  ;;  %v2102_v37 = vshll.u32 %v2859_v21, 16  ;;  %v2057_v23 = vsel %vm3521_vm4, %v2052_v56, %v2056_v8  ;;  %v2910_v41 = vcombine.low %v2335_v44, %v2338_v5  ;;  %p3286_p2 = scmp.lt.s32.totalorder %s2603_s29, %s3284_s6  ;;  %p3287_p4 = scmp.lt.s32.totalorder %s3285_s7, %s3279_s5 }
  0xac   : > { %3159 = vmatprep.mubr.msk.bf16.mxu0 %vm407_vm3, %v2908_v50  ;;  %v2080_v26 = vrot.slane %v2078_v62, 5  ;;  %v2116_v18 = vshll.u32 %v4195_v36, 16  ;;  %v2350_v45 = vrot.slane %v2348_v15, 4  ;;  %v2351_v50 = vrot.slane %v2859_v21, 5 }
  0xad   : > { %v2066_v7 = vrot.slane %v2065_v25, 4  ;;  %v2076_v47 = vrot.slane %v2075_v54, 4  ;;  %v2342_v63 = vsel %vm3655_vm7, %v2902_v28, %v2341_v59  ;;  %v2090_v0 = vrot.slane %v2089_v16, 4  ;;  %p3288_p5 = por %p3287_p4, %p3286_p2 }
  0xae   : > { %v2100_v33 = vrot.slane %v2099_v6, 4  ;;  %v2104_v4 = vrot.slane %v2102_v37, 5  ;;  %v4675_v52 = vshrl.u32 %v4185_v57, 16  ;;  %v4676_v49 = vshll.u32 %v4185_v57, 16 }
  0xaf   : > { %3138 = vmatmul.mubr.msk.bf16.vlgmr.msra.gmra.mxu1 %vm407_vm3, %v2882_v31  ;;  %v2903_v31 = vrot.slane %v4143_v27, 9  ;;  %v2885_v11 = vcombine.low %v2047_v61, %v2057_v23  ;;  %v2118_v39 = vrot.slane %v2116_v18, 5  ;;  %v2122_v58 = vrot.slane %v2120_v10, 4  ;;  %p3289_p6 = pnand %p3288_p5, %p3282_p1 }
  0xb0   : > { %3141 = vmatprep.mubr.msk.bf16.mxu1 %vm407_vm3, %v2883_v19  ;;  %v2345_v19 = vsel %vm3655_vm7, %v2343_v55, %v2344_v42  ;;  %v2109_v34 = vrot.slane %v4675_v52, 4  ;;  %v2112_v27 = vrot.slane %v4676_v49, 5  ;;  %v2355_v48 = vrot.slane %v4195_v36, 5 }
  0xb1   : > { %v2352_v2 = vsel %vm3655_vm7, %v2350_v45, %v2351_v50  ;;  %v2071_v29 = vsel %vm3521_vm4, %v2066_v7, %v4358_v14  ;;  %v2081_v32 = vsel %vm3521_vm4, %v2076_v47, %v2080_v26  ;;  %v2911_v22 = vcombine.low %v2342_v63, %v2345_v19 }
  0xb2   : > { %v2095_v10 = vsel %vm3521_vm4, %v2090_v0, %v4368_v1  ;;  %v2105_v36 = vsel %vm3521_vm4, %v2100_v33, %v2104_v4  ;;  %v2113_v3 = vor.u32 %v2112_v27, %v2109_v34  ;;  %v2126_v9 = vshll.u32 %v2862_v60, 16 }
  0xb3   : > { %3160 = vmatmul.mubr.msk.bf16.gmra.mxu0 %vm407_vm3, %v2909_v12  ;;  %v2349_v12 = vsel %vm3655_vm7, %v2903_v31, %v2348_v15  ;;  %v2904_v13 = vrot.slane %v4185_v57, 9  ;;  %v2123_v59 = vor.u32 %v2122_v58, %v2118_v39  ;;  %v2357_v43 = vrot.slane %v2355_v48, 4 }
  0xb4   : > { %3163 = vmatprep.mubr.msk.bf16.mxu0 %vm407_vm3, %v2910_v41  ;;  %v2912_v14 = vcombine.low %v2349_v12, %v2352_v2  ;;  %v2358_v40 = vrot.slane %v2862_v60, 5  ;;  %v2886_v35 = vcombine.low %v2071_v29, %v2081_v32  ;;  %v2887_v20 = vcombine.low %v2095_v10, %v2105_v36 }
  0xb5   : > { %v2114_v46 = vrot.slane %v2113_v3, 4  ;;  %v2124_v24 = vrot.slane %v2123_v59, 4  ;;  %v2128_v1 = vrot.slane %v2126_v9, 5  ;;  %v2356_v38 = vsel %vm3655_vm7, %v2904_v13, %v2355_v48 }
  0xb6   : > { %v2359_v57 = vsel %vm3655_vm7, %v2357_v43, %v2358_v40 }
  0xb7   : > { %3142 = vmatmul.mubr.msk.bf16.gmra.mxu1 %vm407_vm3, %v2884_v51  ;;  %v2913_v53 = vcombine.low %v2356_v38, %v2359_v57  ;;  %v2119_v56 = vsel %vm3521_vm4, %v2114_v46, %v2118_v39  ;;  %v2129_v8 = vsel %vm3521_vm4, %v2124_v24, %v2128_v1 }
  0xb8   : > { %3145 = vmatprep.mubr.msk.bf16.mxu1 %vm407_vm3, %v2885_v11  ;;  %v2888_v44 = vcombine.low %v2119_v56, %v2129_v8 }
  0xbb   : > { %3164 = vmatmul.mubr.msk.bf16.gmra.mxu0 %vm407_vm3, %v2911_v22 }
  0xbc   : > { %3167 = vmatprep.mubr.msk.bf16.mxu0 %vm407_vm3, %v2912_v14 }
  0xbf   : > { %3146 = vmatmul.mubr.msk.bf16.gmra.mxu1 %vm407_vm3, %v2886_v35 }
  0xc0   : > { %3149 = vmatprep.mubr.msk.bf16.mxu1 %vm407_vm3, %v2887_v20 }
  0xc3   : > { %3168 = vmatmul.mubr.msk.bf16.gmra.mxu0 %vm407_vm3, %v2913_v53 }
  0xc7   : > { %3150 = vmatmul.mubr.msk.bf16.gmra.mxu1 %vm407_vm3, %v2888_v44 }
  0xf2   : > { %v3013_v62 = vpop.f32.mrf.mxu0 }
  0xf4   : > { %v470_v17 = vpop.f32.mrf.mxu0 }
  0xf6   : > { %v3014_v25 = vpop.f32.mrf.mxu0 }
  0xf7   : > { %v3021_v21 = vpop.f32.mrf.mxu1 }
  0xf8   : > { %v473_v15 = vpop.f32.mrf.mxu0 }
  0xf9   : > { %v502_v5 = vpop.f32.mrf.mxu1 }
  0xfb   : > { %v3022_v28 = vpop.f32.mrf.mxu1 }
  0xfd   : > { %v505_v54 = vpop.f32.mrf.mxu1 }
 0x103   : > { %v3017_v55 = vpop.f32.mrf.mxu0 }
 0x105   : > { %v486_v42 = vpop.f32.mrf.mxu0 }
 0x107   : > { %v3025_v16 = vpop.f32.mrf.mxu1  ;;  %v3018_v51 = vpop.f32.mrf.mxu0 }
 0x109   : > { %v518_v61 = vpop.f32.mrf.mxu1  ;;  %v489_v30 = vpop.f32.mrf.mxu0 }
 0x10b   : > { %v3026_v6 = vpop.f32.mrf.mxu1  ;;  %v3049_v37 = vpop.f32.mrf.mxu0 }
 0x10d   : > { %v4436_v23 = vpop.f32.mrf.mxu1  ;;  %v851_v41 = vpop.f32.mrf.mxu0 }
 0x10f   : > { %v3031_v26 = vpop.f32.mrf.mxu1  ;;  %v3050_v18 = vpop.f32.mrf.mxu0 }
 0x110   : > { %v643_v7 = vadd.f32 %v3031_v26, %v3013_v62 }
 0x111   : > { %v634_v31 = vpop.f32.mrf.mxu1  ;;  %v854_v45 = vpop.f32.mrf.mxu0 }
 0x112   : > { %v916_v50 = vadd.f32 %v3049_v37, %v643_v7  ;;  %v635_v47 = vadd.f32 %v634_v31, %v470_v17 }
 0x113   : > { %v3032_v63 = vpop.f32.mrf.mxu1  ;;  %v3053_v19 = vpop.f32.mrf.mxu0 }
 0x114   : > { %v4438_v0 = vadd.f32 %v851_v41, %v635_v47  ;;  %v646_v33 = vadd.f32 %v3032_v63, %v3014_v25 }
 0x115   : > { %v637_v4 = vpop.f32.mrf.mxu1  ;;  %v867_v52 = vpop.f32.mrf.mxu0 }
 0x116   : > { %v4440_v34 = vadd.f32 %v3050_v18, %v646_v33  ;;  %v638_v49 = vadd.f32 %v637_v4, %v473_v15 }
 0x117   : > { %v3035_v27 = vpop.f32.mrf.mxu1  ;;  %v3054_v11 = vpop.f32.mrf.mxu0 }
 0x118   : > { %v4442_v60 = vadd.f32 %v854_v45, %v638_v49  ;;  %v659_v39 = vadd.f32 %v3035_v27, %v3017_v55 }
 0x119   : > { %v650_v58 = vpop.f32.mrf.mxu1  ;;  %v870_v48 = vpop.f32.mrf.mxu0 }
 0x11a   : > { %v920_v12 = vadd.f32 %v3053_v19, %v659_v39  ;;  %v651_v2 = vadd.f32 %v650_v58, %v486_v42 }
 0x11b   : > { %v3036_v29 = vpop.f32.mrf.mxu1  ;;  %v3057_v32 = vpop.f32.mrf.mxu0 }
 0x11c   : > { %v4444_v22 = vadd.f32 %v867_v52, %v651_v2  ;;  %v662_v10 = vadd.f32 %v3036_v29, %v3018_v51 }
 0x11d   : > { %v653_v36 = vpop.f32.mrf.mxu1  ;;  %v883_v3 = vpop.f32.mrf.mxu0 }
 0x11e   : > { %v4446_v9 = vadd.f32 %v3054_v11, %v662_v10  ;;  %v654_v13 = vadd.f32 %v653_v36, %v489_v30 }
 0x11f   : > { %v3039_v14 = vpop.f32.mrf.mxu1  ;;  %v3058_v59 = vpop.f32.mrf.mxu0 }
 0x120   : > { %v4448_v43 = vadd.f32 %v870_v48, %v654_v13  ;;  %v675_v40 = vadd.f32 %v3039_v14, %v3021_v21 }
 0x121   : > { %v666_v35 = vpop.f32.mrf.mxu1  ;;  %v886_v20 = vpop.f32.mrf.mxu0 }
 0x122   : > { %v924_v46 = vadd.f32 %v3057_v32, %v675_v40  ;;  %v667_v24 = vadd.f32 %v666_v35, %v502_v5 }
 0x123   : > { %v3040_v1 = vpop.f32.mrf.mxu1  ;;  %v3061_v38 = vpop.f32.mrf.mxu0 }
 0x124   : > { %v4450_v57 = vadd.f32 %v883_v3, %v667_v24  ;;  %v678_v53 = vadd.f32 %v3040_v1, %v3022_v28 }
 0x125   : > { %v669_v56 = vpop.f32.mrf.mxu1  ;;  %v899_v8 = vpop.f32.mrf.mxu0 }
 0x126   : > { %v4452_v44 = vadd.f32 %v3058_v59, %v678_v53  ;;  %v670_v62 = vadd.f32 %v669_v56, %v505_v54 }
 0x127   : > { %v3043_v17 = vpop.f32.mrf.mxu1  ;;  %v3062_v25 = vpop.f32.mrf.mxu0 }
 0x128   : > { %v4454_v15 = vadd.f32 %v886_v20, %v670_v62  ;;  %v691_v55 = vadd.f32 %v3043_v17, %v3025_v16 }
 0x129   : > { %v682_v21 = vpop.f32.mrf.mxu1  ;;  %v902_v42 = vpop.f32.mrf.mxu0 }
 0x12a   : > { %v928_v51 = vadd.f32 %v3061_v38, %v691_v55  ;;  %v683_v30 = vadd.f32 %v682_v21, %v518_v61 }
 0x12b   : > { %v3044_v5 = vpop.f32.mrf.mxu1  ;;  %v3085_v37 = vpop.f32.mrf.mxu0 }
 0x12c   : > { %v4456_v41 = vadd.f32 %v899_v8, %v683_v30  ;;  %v694_v26 = vadd.f32 %v3044_v5, %v3026_v6 }
 0x12d   : > { %v685_v28 = vpop.f32.mrf.mxu1  ;;  %v4458_v18 = vpop.f32.mrf.mxu0 }
 0x12e   : > { %v4460_v7 = vadd.f32 %v3062_v25, %v694_v26  ;;  %v686_v54 = vadd.f32 %v685_v28, %v4436_v23 }
 0x12f   : > { %v3067_v31 = vpop.f32.mrf.mxu1  ;;  %v4463_v45 = vpop.f32.mrf.mxu0 }
 0x130   : > { %4677 = vst [vmem:[#allocation5_spill] sm:$0xff] %v4460_v7  ;;  %v4465_v16 = vadd.f32 %v902_v42, %v686_v54  ;;  %v1126_v47 = vadd.f32 %v3067_v31, %v916_v50 }
 0x131   : > { %v1061_v63 = vpop.f32.mrf.mxu1  ;;  %v4467_v61 = vpop.f32.mrf.mxu0 }
 0x132   : > { %4678 = vst [vmem:[#allocation6_spill] sm:$0xff] %v4465_v16  ;;  %v4469_v19 = vadd.f32 %v3085_v37, %v1126_v47 }
 0x133   : > { %v3068_v33 = vpop.f32.mrf.mxu1  ;;  %v3089_v6 = vpop.f32.mrf.mxu0 }
 0x135   : > { %v4471_v4 = vpop.f32.mrf.mxu1  ;;  %v4473_v52 = vpop.f32.mrf.mxu0 }
 0x137   : > { %v3071_v49 = vpop.f32.mrf.mxu1  ;;  %v4475_v27 = vpop.f32.mrf.mxu0 }
 0x138   : > { %v1130_v23 = vadd.f32 %v3071_v49, %v920_v12 }
 0x139   : > { %v4477_v11 = vpop.f32.mrf.mxu1  ;;  %v4479_v39 = vpop.f32.mrf.mxu0 }
 0x13a   : > { %v4481_v50 = vadd.f32 %v3089_v6, %v1130_v23 }
 0x13b   : > { %v4483_v58 = vpop.f32.mrf.mxu1  ;;  %v3093_v48 = vpop.f32.mrf.mxu0 }
 0x13d   : > { %v4485_v2 = vpop.f32.mrf.mxu1  ;;  %v4487_v29 = vpop.f32.mrf.mxu0 }
 0x13f   : > { %v3075_v32 = vpop.f32.mrf.mxu1  ;;  %v4489_v10 = vpop.f32.mrf.mxu0 }
 0x140   : > { %v1134_v36 = vadd.f32 %v3075_v32, %v924_v46 }
 0x141   : > { %v4491_v3 = vpop.f32.mrf.mxu1  ;;  %v4493_v12 = vpop.f32.mrf.mxu0 }
 0x142   : > { %v4495_v13 = vadd.f32 %v3093_v48, %v1134_v36 }
 0x143   : > { %v4497_v14 = vpop.f32.mrf.mxu1  ;;  %v3097_v59 = vpop.f32.mrf.mxu0 }
 0x145   : > { %v4499_v40 = vpop.f32.mrf.mxu1  ;;  %v4501_v35 = vpop.f32.mrf.mxu0 }
 0x147   : > { %v3079_v20 = vpop.f32.mrf.mxu1  ;;  %v4503_v24 = vpop.f32.mrf.mxu0 }
 0x148   : > { %4679 = vst [vmem:[#allocation7_spill] sm:$0xff] %v4503_v24  ;;  %v1138_v1 = vadd.f32 %v3079_v20, %v928_v51  ;;  %v1124_v24 = vadd.f32 %v1061_v63, %v4438_v0 }
 0x149   : > { %v4505_v38 = vpop.f32.mrf.mxu1  ;;  %v4507_v46 = vpop.f32.mrf.mxu0 }
 0x14a   : > { %4680 = vst [vmem:[#allocation8_spill] sm:$0xff] %v4507_v46  ;;  %v4509_v53 = vadd.f32 %v3097_v59, %v1138_v1 }
 0x14b   : > { %v4511_v56 = vpop.f32.mrf.mxu1  ;;  %v3121_v8 = vpop.f32.mrf.mxu0 }
 0x14c   : > { %4681 = vst [vmem:[#allocation9_spill] sm:$0xff] %v4509_v53  ;;  %4682 = vst [vmem:[#allocation10_spill] sm:$0xff] %v4511_v56 }
 0x14d   : > { %v4513_v62 = vpop.f32.mrf.mxu1  ;;  %v1859_v17 = vpop.f32.mrf.mxu0 }
 0x14e   : > { %4683 = vst [vmem:[#allocation11_spill] sm:$0xff] %v4513_v62 }
 0x14f   : > { %v3103_v25 = vpop.f32.mrf.mxu1  ;;  %v3122_v55 = vpop.f32.mrf.mxu0 }
 0x151   : > { %v1649_v21 = vpop.f32.mrf.mxu1  ;;  %v1862_v42 = vpop.f32.mrf.mxu0 }
 0x153   : > { %v3104_v30 = vpop.f32.mrf.mxu1  ;;  %v4515_v5 = vpop.f32.mrf.mxu0 }
 0x155   : > { %v1652_v51 = vpop.f32.mrf.mxu1  ;;  %v4517_v37 = vpop.f32.mrf.mxu0 }
 0x157   : > { %v3107_v26 = vpop.f32.mrf.mxu1  ;;  %v4519_v28 = vpop.f32.mrf.mxu0 }
 0x159   : > { %v1665_v54 = vpop.f32.mrf.mxu1  ;;  %v4521_v31 = vpop.f32.mrf.mxu0 }
 0x15b   : > { %v3108_v47 = vpop.f32.mrf.mxu1  ;;  %v4523_v6 = vpop.f32.mrf.mxu0 }
 0x15c   : > { %4684 = vst [vmem:[#allocation12_spill] sm:$0xff] %v4523_v6 }
 0x15d   : > { %v1668_v49 = vpop.f32.mrf.mxu1  ;;  %v4525_v23 = vpop.f32.mrf.mxu0 }
 0x15e   : > { %4685 = vst [vmem:[#allocation13_spill] sm:$0xff] %v4525_v23 }
 0x15f   : > { %v4527_v48 = vpop.f32.mrf.mxu1  ;;  %v4529_v32 = vpop.f32.mrf.mxu0 }
 0x160   : > { %4686 = vst [vmem:[#allocation14_spill] sm:$0xff] %v4529_v32  ;;  %v1127_v32 = vadd.f32 %v3068_v33, %v4440_v34  ;;  %v1128_v33 = vadd.f32 %v4477_v11, %v4444_v22 }
 0x161   : > { %v4531_v36 = vpop.f32.mrf.mxu1  ;;  %v4533_v59 = vpop.f32.mrf.mxu0 }
 0x162   : > { %4687 = vst [vmem:[#allocation15_spill] sm:$0xff] %v4533_v59  ;;  %v1482_v59 = vadd.f32 %v4458_v18, %v1124_v24  ;;  %v1485_v0 = vadd.f32 %v4463_v45, %v1127_v32  ;;  %v1131_v18 = vadd.f32 %v4483_v58, %v4446_v9  ;;  %v1129_v45 = vadd.f32 %v4485_v2, %v4448_v43 }
 0x163   : > { %v4535_v20 = vpop.f32.mrf.mxu1  ;;  %v4537_v1 = vpop.f32.mrf.mxu0  ;;  %v1132_v9 = vadd.f32 %v4491_v3, %v4450_v57  ;;  %v1135_v43 = vadd.f32 %v4497_v14, %v4452_v44  ;;  %v1133_v44 = vadd.f32 %v4499_v40, %v4454_v15 }
 0x164   : > { %4688 = vst [vmem:[#allocation16_spill] sm:$0xff] %v4537_v1  ;;  %v1125_v1 = vadd.f32 %v4471_v4, %v4442_v60  ;;  %v1712_v7 = vadd.f32 %v1649_v21, %v1482_v59  ;;  %v1715_v60 = vadd.f32 %v3104_v30, %v1485_v0  ;;  %v1489_v22 = vadd.f32 %v4475_v27, %v1131_v18 }
 0x165   : > { %v4539_v53 = vpop.f32.mrf.mxu1  ;;  %v4541_v46 = vpop.f32.mrf.mxu0  ;;  %v1487_v30 = vadd.f32 %v4479_v39, %v1129_v45  ;;  %v1490_v57 = vadd.f32 %v4487_v29, %v1132_v9  ;;  %v1136_v29 = vadd.f32 %v4505_v38, %v4456_v41 }
 0x166   : > { %4689 = vst [vmem:[#allocation17_spill] sm:$0xff] %v4541_v46  ;;  %v1483_v34 = vadd.f32 %v4467_v61, %v1125_v1  ;;  %v1486_v61 = vadd.f32 %v4473_v52, %v1128_v33  ;;  %v1718_v52 = vadd.f32 %v3107_v26, %v4481_v50 }
 0x167   : > { %v4544_v6 = vpop.f32.mrf.mxu1  ;;  %v4546_v23 = vpop.f32.mrf.mxu0  ;;  %v1720_v45 = vadd.f32 %v4531_v36, %v1490_v57 }
 0x168   : > { %4690 = vst [vmem:[#allocation18_spill] sm:$0xff] %v4546_v23  ;;  %v1713_v21 = vadd.f32 %v1652_v51, %v1483_v34  ;;  %v1717_v51 = vadd.f32 %v1668_v49, %v1487_v30  ;;  %v1928_v50 = vadd.f32 %v4515_v5, %v1718_v52  ;;  %v4697_v52 = vld [vmem:[#allocation11_spill] sm:$0xff] }
 0x169   : > { %v4549_v62 = vpop.f32.mrf.mxu1  ;;  %v4551_v16 = vpop.f32.mrf.mxu0 }
 0x16a   : > { %4691 = vst [vmem:[#allocation19_spill] sm:$0xff] %v4551_v16  ;;  %v1714_v16 = vadd.f32 %v3103_v25, %v4469_v19  ;;  %v1925_v19 = vadd.f32 %v3122_v55, %v1715_v60  ;;  %v1923_v58 = vadd.f32 %v1862_v42, %v1713_v21  ;;  %v1719_v55 = vadd.f32 %v3108_v47, %v1489_v22 }
 0x16b   : > { %v4556_v56 = vpop.f32.mrf.mxu1  ;;  %v3157_v46 = vpop.f32.mrf.mxu0  ;;  %v1722_v21 = vadd.f32 %v4527_v48, %v4495_v13 }
 0x16c   : > { %4692 = vst [vmem:[#allocation20_spill] sm:$0xff] %v4556_v56  ;;  %v1922_v56 = vadd.f32 %v1859_v17, %v1712_v7  ;;  %v1924_v1 = vadd.f32 %v3121_v8, %v1714_v16  ;;  %v1716_v7 = vadd.f32 %v1665_v54, %v1486_v61  ;;  %v1493_v54 = vadd.f32 %v4489_v10, %v1135_v43  ;;  %v4696_v43 = vld [vmem:[#allocation6_spill] sm:$0xff] }
 0x16d   : > { %v4559_v63 = vpop.f32.mrf.mxu1  ;;  %v2447_v23 = vpop.f32.mrf.mxu0 }
 0x16e   : > { %4693 = vst [vmem:[#allocation21_spill] sm:$0xff] %v4559_v63  ;;  %v1926_v3 = vadd.f32 %v4517_v37, %v1716_v7  ;;  %v1927_v37 = vadd.f32 %v4521_v31, %v1717_v51  ;;  %v1723_v22 = vadd.f32 %v4535_v20, %v1493_v54  ;;  %v4694_v7 = vld [vmem:[#allocation5_spill] sm:$0xff] }
 0x16f   : > { %v3139_v4 = vpop.f32.mrf.mxu1  ;;  %v3158_v24 = vpop.f32.mrf.mxu0 }
 0x170   : > { %v2282_v17 = vadd.f32 %v3139_v4, %v1924_v1  ;;  %v1494_v1 = vadd.f32 %v4501_v35, %v1136_v29  ;;  %v4699_v35 = vld [vmem:[#allocation13_spill] sm:$0xff] }
 0x171   : > { %v2217_v32 = vpop.f32.mrf.mxu1  ;;  %v2450_v59 = vpop.f32.mrf.mxu0 }
 0x172   : > { %v2280_v63 = vadd.f32 %v2217_v32, %v1922_v56  ;;  %v2512_v42 = vadd.f32 %v3157_v46, %v2282_v17  ;;  %v1929_v46 = vadd.f32 %v4519_v28, %v1719_v55  ;;  %v4695_v17 = vld [vmem:[#allocation10_spill] sm:$0xff] }
 0x173   : > { %v3140_v11 = vpop.f32.mrf.mxu1  ;;  %v3161_v25 = vpop.f32.mrf.mxu0  ;;  %v1139_v30 = vadd.f32 %v4695_v17, %v4694_v7 }
 0x174   : > { %v2283_v16 = vadd.f32 %v3140_v11, %v1925_v19  ;;  %v2510_v27 = vadd.f32 %v2447_v23, %v2280_v63  ;;  %v2550_v15 = vmul.f32 %v2512_v42, %v2512_v42 }
 0x175   : > { %v2220_v2 = vpop.f32.mrf.mxu1  ;;  %v2463_v56 = vpop.f32.mrf.mxu0 }
 0x176   : > { %v2281_v8 = vadd.f32 %v2220_v2, %v1923_v58  ;;  %v2513_v14 = vadd.f32 %v3158_v24, %v2283_v16  ;;  %v2548_v47 = vmul.f32 %v2510_v27, %v2510_v27  ;;  %v1491_v24 = vadd.f32 %v4493_v12, %v1133_v44  ;;  %v4698_v2 = vld [vmem:[#allocation12_spill] sm:$0xff]  ;;  %v4701_v44 = vld [vmem:[#allocation15_spill] sm:$0xff] }
 0x177   : > { %v3143_v0 = vpop.f32.mrf.mxu1  ;;  %v3162_v34 = vpop.f32.mrf.mxu0  ;;  %v1137_v16 = vadd.f32 %v4697_v52, %v4696_v43 }
 0x178   : > { %v2511_v39 = vadd.f32 %v2450_v59, %v2281_v8  ;;  %v2286_v10 = vadd.f32 %v3143_v0, %v1928_v50  ;;  %v2551_v32 = vmul.f32 %v2513_v14, %v2513_v14  ;;  %v1721_v19 = vadd.f32 %v4539_v53, %v1491_v24  ;;  %v4700_v0 = vld [vmem:[#allocation14_spill] sm:$0xff] }
 0x179   : > { %v2233_v26 = vpop.f32.mrf.mxu1  ;;  %v2466_v23 = vpop.f32.mrf.mxu0  ;;  %v1933_v57 = vadd.f32 %v4700_v0, %v1723_v22 }
 0x17a   : > { %v2526_v49 = vadd.f32 %v2511_v39, %v2510_v27  ;;  %v2549_v63 = vmul.f32 %v2511_v39, %v2511_v39  ;;  %v2284_v33 = vadd.f32 %v2233_v26, %v1926_v3  ;;  %v2516_v11 = vadd.f32 %v3161_v25, %v2286_v10 }
 0x17b   : > { %v3144_v18 = vpop.f32.mrf.mxu1  ;;  %v3165_v60 = vpop.f32.mrf.mxu0  ;;  %v1930_v27 = vadd.f32 %v4699_v35, %v1720_v45  ;;  %v1724_v3 = vadd.f32 %v4549_v62, %v1494_v1  ;;  %v1931_v50 = vadd.f32 %v4701_v44, %v1721_v19  ;;  %v4707_v1 = vld [vmem:[#allocation21_spill] sm:$0xff] }
 0x17c   : > { %v2527_v40 = vadd.f32 %v2526_v49, %v2512_v42  ;;  %v2564_v5 = vadd.f32 %v2549_v63, %v2548_v47  ;;  %v2514_v4 = vadd.f32 %v2463_v56, %v2284_v33  ;;  %v2287_v31 = vadd.f32 %v3144_v18, %v1929_v46  ;;  %v4702_v49 = vld [vmem:[#allocation7_spill] sm:$0xff] }
 0x17d   : > { %v2236_v41 = vpop.f32.mrf.mxu1  ;;  %v2479_v38 = vpop.f32.mrf.mxu0  ;;  %v1932_v56 = vadd.f32 %v4698_v2, %v1722_v21  ;;  %v1497_v63 = vadd.f32 %v4702_v49, %v1139_v30 }
 0x17e   : > { %v2565_v28 = vadd.f32 %v2564_v5, %v2550_v15  ;;  %v2528_v59 = vadd.f32 %v2527_v40, %v2513_v14  ;;  %v2285_v61 = vadd.f32 %v2236_v41, %v1927_v37  ;;  %v2552_v13 = vmul.f32 %v2514_v4, %v2514_v4  ;;  %v4703_v15 = vld [vmem:[#allocation8_spill] sm:$0xff]  ;;  %v4704_v40 = vld [vmem:[#allocation9_spill] sm:$0xff] }
 0x17f   : > { %v3147_v12 = vpop.f32.mrf.mxu1  ;;  %v3166_v9 = vpop.f32.mrf.mxu0  ;;  %v2517_v25 = vadd.f32 %v3162_v34, %v2287_v31  ;;  %v2554_v14 = vmul.f32 %v2516_v11, %v2516_v11  ;;  %v1495_v62 = vadd.f32 %v4703_v15, %v1137_v16  ;;  %v1726_v5 = vadd.f32 %v4544_v6, %v4704_v40  ;;  %v4706_v31 = vld [vmem:[#allocation20_spill] sm:$0xff]  ;;  %v4709_v16 = vld [vmem:[#allocation18_spill] sm:$0xff] }
 0x180   : > { %v2529_v58 = vadd.f32 %v2528_v59, %v2514_v4  ;;  %v2566_v48 = vadd.f32 %v2565_v28, %v2551_v32  ;;  %v2515_v36 = vadd.f32 %v2466_v23, %v2285_v61  ;;  %v2290_v42 = vadd.f32 %v3147_v12, %v1932_v56  ;;  %v4705_v4 = vld [vmem:[#allocation17_spill] sm:$0xff]  ;;  %v4708_v6 = vld [vmem:[#allocation16_spill] sm:$0xff]  ;;  %v4710_v56 = vld [vmem:[#allocation19_spill] sm:$0xff] }
 0x181   : > { %v2249_v20 = vpop.f32.mrf.mxu1  ;;  %v2482_v8 = vpop.f32.mrf.mxu0  ;;  %v2555_v46 = vmul.f32 %v2517_v25, %v2517_v25  ;;  %v1934_v24 = vadd.f32 %v4705_v4, %v1724_v3  ;;  %v1727_v61 = vadd.f32 %v4706_v31, %v1497_v63  ;;  %v1725_v22 = vadd.f32 %v4707_v1, %v1495_v62 }
 0x182   : > { %v2567_v53 = vadd.f32 %v2566_v48, %v2552_v13  ;;  %v2530_v55 = vadd.f32 %v2529_v58, %v2515_v36  ;;  %v2553_v51 = vmul.f32 %v2515_v36, %v2515_v36  ;;  %v2288_v39 = vadd.f32 %v2249_v20, %v1930_v27 }
 0x183   : > { %v3148_v54 = vpop.f32.mrf.mxu1  ;;  %v3169_v47 = vpop.f32.mrf.mxu0  ;;  %v2520_v21 = vadd.f32 %v3165_v60, %v2290_v42  ;;  %v1936_v36 = vadd.f32 %v4708_v6, %v1726_v5  ;;  %v1937_v2 = vadd.f32 %v4709_v16, %v1727_v61  ;;  %v1935_v35 = vadd.f32 %v4710_v56, %v1725_v22 }
 0x184   : > { %v2531_v26 = vadd.f32 %v2530_v55, %v2516_v11  ;;  %v2568_v23 = vadd.f32 %v2567_v53, %v2553_v51  ;;  %v2518_v33 = vadd.f32 %v2479_v38, %v2288_v39  ;;  %v2291_v29 = vadd.f32 %v3148_v54, %v1933_v57 }
 0x185   : > { %v2252_v34 = vpop.f32.mrf.mxu1  ;;  %v2495_v38 = vpop.f32.mrf.mxu0  ;;  %v2558_v60 = vmul.f32 %v2520_v21, %v2520_v21 }
 0x186   : > { %v2569_v37 = vadd.f32 %v2568_v23, %v2554_v14  ;;  %v2532_v10 = vadd.f32 %v2531_v26, %v2517_v25  ;;  %v2289_v18 = vadd.f32 %v2252_v34, %v1931_v50  ;;  %v2556_v41 = vmul.f32 %v2518_v33, %v2518_v33 }
 0x187   : > { %v3151_v45 = vpop.f32.mrf.mxu1  ;;  %v2521_v19 = vadd.f32 %v3166_v9, %v2291_v29  ;;  %v3170_v52 = vpop.f32.mrf.mxu0 }
 0x188   : > { %v2533_v32 = vadd.f32 %v2532_v10, %v2518_v33  ;;  %v2570_v28 = vadd.f32 %v2569_v37, %v2555_v46  ;;  %v2519_v59 = vadd.f32 %v2482_v8, %v2289_v18  ;;  %v2294_v27 = vadd.f32 %v3151_v45, %v1936_v36 }
 0x189   : > { %v2265_v11 = vpop.f32.mrf.mxu1  ;;  %v2559_v9 = vmul.f32 %v2521_v19, %v2521_v19  ;;  %v2498_v3 = vpop.f32.mrf.mxu0 }
 0x18a   : > { %v2571_v12 = vadd.f32 %v2570_v28, %v2556_v41  ;;  %v2534_v58 = vadd.f32 %v2533_v32, %v2519_v59  ;;  %v2557_v13 = vmul.f32 %v2519_v59, %v2519_v59  ;;  %v2292_v48 = vadd.f32 %v2265_v11, %v1934_v24 }
 0x18b   : > { %v3152_v7 = vpop.f32.mrf.mxu1  ;;  %v2524_v42 = vadd.f32 %v3169_v47, %v2294_v27 }
 0x18c   : > { %v2535_v17 = vadd.f32 %v2534_v58, %v2520_v21  ;;  %v2572_v30 = vadd.f32 %v2571_v12, %v2557_v13  ;;  %v2522_v43 = vadd.f32 %v2495_v38, %v2292_v48  ;;  %v2295_v25 = vadd.f32 %v3152_v7, %v1937_v2 }
 0x18d   : > { %v2268_v20 = vpop.f32.mrf.mxu1  ;;  %v2562_v26 = vmul.f32 %v2524_v42, %v2524_v42 }
 0x18e   : > { %v2573_v8 = vadd.f32 %v2572_v30, %v2558_v60  ;;  %v2536_v53 = vadd.f32 %v2535_v17, %v2521_v19  ;;  %v2293_v55 = vadd.f32 %v2268_v20, %v1935_v35  ;;  %v2560_v0 = vmul.f32 %v2522_v43, %v2522_v43 }
 0x18f   : > { %v2525_v44 = vadd.f32 %v3170_v52, %v2295_v25 }
 0x190   : > { %v2537_v51 = vadd.f32 %v2536_v53, %v2522_v43  ;;  %v2574_v57 = vadd.f32 %v2573_v8, %v2559_v9  ;;  %v2523_v39 = vadd.f32 %v2498_v3, %v2293_v55 }
 0x191   : > { %v2563_v63 = vmul.f32 %v2525_v44, %v2525_v44 }
 0x192   : > { %v2575_v54 = vadd.f32 %v2574_v57, %v2560_v0  ;;  %v2538_v50 = vadd.f32 %v2537_v51, %v2523_v39  ;;  %v2561_v14 = vmul.f32 %v2523_v39, %v2523_v39 }
 0x194   : > { %v2539_v23 = vadd.f32 %v2538_v50, %v2524_v42  ;;  %v2576_v49 = vadd.f32 %v2575_v54, %v2561_v14 }
 0x196   : > { %v2540_v33 = vadd.f32 %v2539_v23, %v2525_v44  ;;  %v2577_v29 = vadd.f32 %v2576_v49, %v2562_v26 }
 0x198   : > { %v2541_v34 = vrot.slane %v2540_v33, 4  ;;  %v2578_v46 = vadd.f32 %v2577_v29, %v2563_v63 }
 0x19a   : > { %v2542_v37 = vadd.f32 %v2541_v34, %v2540_v33  ;;  %v2579_v10 = vrot.slane %v2578_v46, 4 }
 0x19c   : > { %v2543_v47 = vrot.slane %v2542_v37, 2  ;;  %v2580_v18 = vadd.f32 %v2579_v10, %v2578_v46 }
 0x19e   : > { %v2544_v15 = vadd.f32 %v2543_v47, %v2542_v37  ;;  %v2581_v62 = vrot.slane %v2580_v18, 2 }
 0x1a0   : > { %v2545_v40 = vrot.slane %v2544_v15, 1  ;;  %v2582_v5 = vadd.f32 %v2581_v62, %v2580_v18 }
 0x1a2   : > { %v2546_v4 = vadd.f32 %v2545_v40, %v2544_v15  ;;  %v2583_v24 = vrot.slane %v2582_v5, 1 }
 0x1a4   : > { %2547 = vst [vmem:[%s150_s28] sm:$0x1] %v2546_v4  ;;  %v2584_v21 = vadd.f32 %v2583_v24, %v2582_v5 }
 0x1a6   : > { %2585 = vst [vmem:[%s150_s28 + $0x1] sm:$0x1] %v2584_v21 }
 0x1a7   : > { %3292 = shalt.err (!%p3289_p6)
}
 0x1a8   : > { %s3293_s8 = scalar_lea.hbm %s2600_s4, 32  ;;  %s3297_s21 = scalar_lea.hbm %s4661_s2, 128 }
 0x1a9   : > { %p3294_p7 = scmp.ne.s32.totalorder %s2600_s4, %s3293_s8  ;;  %p3298_p11 = scmp.lt.s32.totalorder %s2600_s4, %s4661_s2 }
 0x1aa   : > { %p3299_p12 = scmp.lt.s32.totalorder %s3297_s21, %s3293_s8 }
 0x1ab   : > { %p3295_p9 = pnand %p3294_p7, %p3440_p3 }
 0x1ac   : > { %p3300_p13 = por %p3299_p12, %p3298_p11 }
 0x1ad   : > { %p3296_p10 = pneg %p3295_p9 }
 0x1af   : > { %p3301_p0 = pnand %p3300_p13, %p3296_p10 }
 0x1b1   : > { %3304 = shalt.err (!%p3301_p0)
}
 0x1b2   : > { %3184 = dma.vmem_to_hbm [thread:$0]  (%p3440_p3), %s2603_s29, 32, %s2600_s4, %s2587_s13  }
 0x1b3 PF: > { %p3190_p1 = scmp.ge.s32.totalorder %s3371_s16, 2  ;;  %s2614_s26 = sand.u32 1, %s3343_s9  }
 0x1b4   : > { %s2615_s28 = scalar_lea.sflag [#allocation3], %s2614_s26 }
 0x1b5   : > { %p3187_p2 = pnand %p3190_p1, %p3449_p8 }
 0x1b7   : > { %p3188_p4 = pneg %p3187_p2 }
 0x1b9   : > { %3338 = dma.done.wait (%p3188_p4), %s2615_s28, 32  }
 0x1ba   : > { %3340 = vsyncadd (%p3188_p4), %s2615_s28, 4294967264  ;;  %s15_s16 = sadd.s32 1, %s3371_s16   ;;  %s4711_s9 = smov %s3347_s10 }
 0x1bb   : > { %p12_p5 = scmp.ge.s32.totalorder %s15_s16, 6   ;;  %s4712_s10 = smov %s3351_s11 }
 0x1bc   : > { %s4713_s11 = smov %s3458_s27  ;;  %s4714_s12 = smov %s3363_s14 }
 0x1bd   : > { %s4715_s13 = smov %s3367_s15  ;;  %s4716_s14 = smov %s4719_s19 }
 0x1be   : > { %s4717_s15 = smov %s4723_s20  ;;  %14 = sbr.rel (!%p12_p5) target bundleno = 5 (0x5), region = 74 }
 0x1c3   :  { %2620 = vsyncpa [#allocation3], 1 }
 0x1c4   :  { %2622 = vsyncpa [#allocation3 + $0x1], 1 }

</bundles_post_ra>
